<compile_context>
chip_gen: v5e
topology: v5e:2x2
jax: 0.10.0
libtpu: 0.0.40
codegen_flags: <defaults>
</compile_context>

<pallas_src>
import jax
import jax.numpy as jnp
from jax import lax
from jax.experimental import pallas as pl
from jax.experimental.pallas import tpu as pltpu


_LANE = 128


def _round_up(x, m):
    return ((x + m - 1) // m) * m


def _pad_axis(x, axis, target):
    pad = target - x.shape[axis]
    if pad == 0:
        return x
    widths = [(0, 0)] * x.ndim
    widths[axis] = (0, pad)
    return jnp.pad(x, widths)


def _dqn2_kernel(idx_ref,            # (tb, 1)   int32  VMEM
                 emb_ref,            # (V_p, E_p) bf16  VMEM (resident)
                 w1_ref, b1_ref,     # (E_p, F1_p) bf16 ; (1, F1_p) f32
                 w2_ref, b2_ref,     # (F1_p, F2_p) bf16; (1, F2_p) f32
                 w3_ref, b3_ref,     # (F2_p, A_p) bf16 ; (1, A_p) f32
                 out_ref):           # (tb, A_p) f32
    tb = idx_ref.shape[0]
    vocab = emb_ref.shape[0]

    # --- Embedding lookup as a one-hot bf16 MXU matmul (exact gather). ---
    idx = idx_ref[...]                                               # (tb, 1) int32
    onehot = (lax.broadcasted_iota(jnp.int32, (tb, vocab), 1)
              == idx).astype(jnp.bfloat16)                           # (tb, V_p)
    x = jnp.dot(onehot, emb_ref[...],
                preferred_element_type=jnp.float32)                  # (tb, E_p) f32
    x = x.astype(jnp.bfloat16)

    # --- MLP: bf16 MXU matmuls, f32 accumulation, f32 bias/ReLU. ---
    h1 = jnp.dot(x, w1_ref[...], preferred_element_type=jnp.float32) + b1_ref[...]
    h1 = jnp.maximum(h1, 0.0).astype(jnp.bfloat16)
    # dropout1: identity in eval mode

    h2 = jnp.dot(h1, w2_ref[...], preferred_element_type=jnp.float32) + b2_ref[...]
    h2 = jnp.maximum(h2, 0.0).astype(jnp.bfloat16)
    # dropout2: identity in eval mode

    out_ref[...] = (jnp.dot(h2, w3_ref[...], preferred_element_type=jnp.float32)
                    + b3_ref[...])


def dqn2_forward(state, emb, w1, b1, w2, b2, w3, b3, *, block_b=None):
    """Forward pass of DeepQNetwork2 as a single tiled Pallas kernel.

    state: (B,) integer indices into the embedding table.
    emb:   (input_dims, emb_dims) float32
    w*:    (in_features, out_features) (transposed from PyTorch layout)
    b*:    (1, out_features) or (out_features,)
    returns: (B, n_actions) float32
    """
    B = state.shape[0]
    V, E = emb.shape
    F1 = w1.shape[1]
    F2 = w2.shape[1]
    A = w3.shape[1]

    E_p = _round_up(E, _LANE)
    F1_p = _round_up(F1, _LANE)
    F2_p = _round_up(F2, _LANE)
    A_p = _round_up(A, _LANE)
    V_p = _round_up(V, _LANE)

    # Single fused grid step for small batches (kernel is latency-bound);
    # tile at 256 rows otherwise (batch axis marked "parallel" for megacore).
    B8 = _round_up(B, 8)
    if block_b is None:
        tb = B8 if B8 <= 512 else 256
    else:
        tb = min(block_b, B8)
    B_p = _round_up(B, tb)

    # Host-side padding (zeros propagate exactly through matmul/bias/ReLU;
    # padded batch rows use index 0 and are sliced off).
    idx = _pad_axis(state.astype(jnp.int32), 0, B_p).reshape(B_p, 1)
    emb_p = _pad_axis(_pad_axis(emb, 0, V_p), 1, E_p).astype(jnp.bfloat16)
    w1_p = _pad_axis(_pad_axis(w1, 0, E_p), 1, F1_p).astype(jnp.bfloat16)
    w2_p = _pad_axis(_pad_axis(w2, 0, F1_p), 1, F2_p).astype(jnp.bfloat16)
    w3_p = _pad_axis(_pad_axis(w3, 0, F2_p), 1, A_p).astype(jnp.bfloat16)
    b1_p = _pad_axis(jnp.reshape(b1, (1, -1)).astype(jnp.float32), 1, F1_p)
    b2_p = _pad_axis(jnp.reshape(b2, (1, -1)).astype(jnp.float32), 1, F2_p)
    b3_p = _pad_axis(jnp.reshape(b3, (1, -1)).astype(jnp.float32), 1, A_p)

    grid = (B_p // tb,)

    # Rough VMEM budget (x2 for double buffering) + activation/internal headroom.
    resident_bytes = (2 * V_p * E_p
                      + 2 * (E_p * F1_p + F1_p * F2_p + F2_p * A_p)
                      + 4 * (F1_p + F2_p + A_p))
    tile_bytes = 4 * tb + 4 * tb * A_p + 2 * tb * (V_p + E_p + F1_p + F2_p)
    vmem_limit = int(min(max(2 * (resident_bytes + tile_bytes) + (4 << 20), 8 << 20),
                         32 << 20))

    flops = 2 * B_p * (V_p * E_p + E_p * F1_p + F1_p * F2_p + F2_p * A_p)
    bytes_accessed = (2 * V_p * E_p
                      + 2 * (E_p * F1_p + F1_p * F2_p + F2_p * A_p)
                      + 4 * (F1_p + F2_p + A_p)
                      + 4 * B_p               # indices
                      + 4 * B_p * A_p)        # output

    grid_spec = pltpu.PrefetchScalarGridSpec(
        num_scalar_prefetch=0,
        grid=grid,
        in_specs=[
            pl.BlockSpec((tb, 1), lambda i: (i, 0)),            # indices (per tile)
            pl.BlockSpec((V_p, E_p), lambda i: (0, 0)),         # table resident
            pl.BlockSpec((E_p, F1_p), lambda i: (0, 0)),        # weights resident
            pl.BlockSpec((1, F1_p), lambda i: (0, 0)),
            pl.BlockSpec((F1_p, F2_p), lambda i: (0, 0)),
            pl.BlockSpec((1, F2_p), lambda i: (0, 0)),
            pl.BlockSpec((F2_p, A_p), lambda i: (0, 0)),
            pl.BlockSpec((1, A_p), lambda i: (0, 0)),
        ],
        out_specs=pl.BlockSpec((tb, A_p), lambda i: (i, 0)),
    )

    out_p = pl.pallas_call(
        _dqn2_kernel,
        out_shape=jax.ShapeDtypeStruct((B_p, A_p), jnp.float32),
        grid_spec=grid_spec,
        compiler_params=pltpu.CompilerParams(
            dimension_semantics=("parallel",),
            vmem_limit_bytes=vmem_limit),
        cost_estimate=pl.CostEstimate(flops=int(flops), transcendentals=0,
                                      bytes_accessed=int(bytes_accessed)),
    )(idx, emb_p, w1_p, b1_p, w2_p, b2_p, w3_p, b3_p)

    return out_p[:B, :A]


def init_params(key, input_dims, emb_dims, fc1_dims, fc2_dims, n_actions):
    """Deterministic, PyTorch-style initialization (synthetic, not a checkpoint)."""
    ks = jax.random.split(key, 7)
    # nn.Embedding: N(0, 1)
    emb = jax.random.normal(ks[0], (input_dims, emb_dims), jnp.float32)

    def linear(kw, kb, fan_in, fan_out):
        bound = 1.0 / jnp.sqrt(jnp.float32(fan_in))
        w = jax.random.uniform(kw, (fan_in, fan_out), jnp.float32, -bound, bound)
        b = jax.random.uniform(kb, (1, fan_out), jnp.float32, -bound, bound)
        return w, b

    w1, b1 = linear(ks[1], ks[2], emb_dims, fc1_dims)
    w2, b2 = linear(ks[3], ks[4], fc1_dims, fc2_dims)
    w3, b3 = linear(ks[5], ks[6], fc2_dims, n_actions)
    return emb, w1, b1, w2, b2, w3, b3


if __name__ == "__main__":
    # Small shapes consistent with the module's forward:
    # state: (B,) integer indices; vocab = input_dims.
    B = 256
    input_dims = 512    # embedding vocabulary size (state space)
    emb_dims = 32
    fc1_dims = 64
    fc2_dims = 64
    n_actions = 8

    key = jax.random.PRNGKey(0)
    kp, ks = jax.random.split(key)
    emb, w1, b1, w2, b2, w3, b3 = init_params(
        kp, input_dims, emb_dims, fc1_dims, fc2_dims, n_actions)
    state = jax.random.randint(ks, (B,), 0, input_dims, dtype=jnp.int32)

    actions = dqn2_forward(state, emb, w1, b1, w2, b2, w3, b3)
    jax.block_until_ready(actions)
    assert actions.shape == (B, n_actions)

    # Reference with the same bf16 weight/activation rounding the kernel uses
    # (accumulation in f32), so tolerances can stay tight.  The kernel's one-hot
    # gather of the bf16 table is exact, matching emb.astype(bf16)[state].
    bf = jnp.bfloat16
    x = emb.astype(bf)[state]
    h1 = jnp.maximum(
        jnp.dot(x, w1.astype(bf), preferred_element_type=jnp.float32) + b1, 0.0
    ).astype(bf)
    h2 = jnp.maximum(
        jnp.dot(h1, w2.astype(bf), preferred_element_type=jnp.float32) + b2, 0.0
    ).astype(bf)
    ref = jnp.dot(h2, w3.astype(bf), preferred_element_type=jnp.float32) + b3

    max_err = float(jnp.max(jnp.abs(actions - ref)))
    assert jnp.allclose(actions, ref, atol=2e-2, rtol=2e-2), max_err

    print("KERNEL_OK")
</pallas_src>

<mosaic_0001>
module attributes {stable_mosaic.version = 11 : i64} {
  func.func @_dqn2_kernel(%arg0: i32, %arg1: memref<256x1xi32, #tpu.memory_space<vmem>>, %arg2: memref<512x128xbf16, #tpu.memory_space<vmem>>, %arg3: memref<128x128xbf16, #tpu.memory_space<vmem>>, %arg4: memref<1x128xf32, #tpu.memory_space<vmem>>, %arg5: memref<128x128xbf16, #tpu.memory_space<vmem>>, %arg6: memref<1x128xf32, #tpu.memory_space<vmem>>, %arg7: memref<128x128xbf16, #tpu.memory_space<vmem>>, %arg8: memref<1x128xf32, #tpu.memory_space<vmem>>, %arg9: memref<256x128xf32, #tpu.memory_space<vmem>>) attributes {dimension_semantics = [#tpu.dimension_semantics<parallel>], iteration_bounds = array<i64: 1>, scalar_prefetch = 0 : i64, scratch_operands = 0 : i64, tpu.core_type = #tpu.core_type<tc>, window_params = [{transform_indices = @transform_0, window_bounds = array<i64: 256, 1>}, {pipeline_mode = #tpu.pipeline_mode<synchronous>, transform_indices = @transform_1, window_bounds = array<i64: 512, 128>}, {pipeline_mode = #tpu.pipeline_mode<synchronous>, transform_indices = @transform_2, window_bounds = array<i64: 128, 128>}, {pipeline_mode = #tpu.pipeline_mode<synchronous>, transform_indices = @transform_3, window_bounds = array<i64: 1, 128>}, {pipeline_mode = #tpu.pipeline_mode<synchronous>, transform_indices = @transform_4, window_bounds = array<i64: 128, 128>}, {pipeline_mode = #tpu.pipeline_mode<synchronous>, transform_indices = @transform_5, window_bounds = array<i64: 1, 128>}, {pipeline_mode = #tpu.pipeline_mode<synchronous>, transform_indices = @transform_6, window_bounds = array<i64: 128, 128>}, {pipeline_mode = #tpu.pipeline_mode<synchronous>, transform_indices = @transform_7, window_bounds = array<i64: 1, 128>}, {transform_indices = @transform_8, window_bounds = array<i64: 256, 128>}]} {
    %c0 = arith.constant 0 : index
    %c0_0 = arith.constant 0 : index
    %0 = vector.load %arg1[%c0, %c0_0] : memref<256x1xi32, #tpu.memory_space<vmem>>, vector<256x1xi32>
    %1 = tpu.iota {dimensions = array<i32: 1>} : vector<256x512xi32>
    %2 = vector.broadcast %0 : vector<256x1xi32> to vector<256x512xi32>
    %3 = arith.cmpi eq, %1, %2 : vector<256x512xi32>
    %4 = arith.extui %3 : vector<256x512xi1> to vector<256x512xi32>
    %5 = arith.sitofp %4 : vector<256x512xi32> to vector<256x512xf32>
    %6 = arith.truncf %5 : vector<256x512xf32> to vector<256x512xbf16>
    %c0_1 = arith.constant 0 : index
    %c0_2 = arith.constant 0 : index
    %7 = vector.load %arg2[%c0_1, %c0_2] : memref<512x128xbf16, #tpu.memory_space<vmem>>, vector<512x128xbf16>
    %cst = arith.constant dense<0.000000e+00> : vector<256x128xf32>
    %8 = tpu.matmul %6, %7, %cst {dimension_numbers = #tpu.dot_dimension_numbers<[1], [0], [0], [1], [0, 0, 1, 1], [], []>} : vector<256x512xbf16>, vector<512x128xbf16>, vector<256x128xf32> -> vector<256x128xf32>
    %9 = arith.truncf %8 : vector<256x128xf32> to vector<256x128xbf16>
    %c0_3 = arith.constant 0 : index
    %c0_4 = arith.constant 0 : index
    %10 = vector.load %arg3[%c0_3, %c0_4] : memref<128x128xbf16, #tpu.memory_space<vmem>>, vector<128x128xbf16>
    %cst_5 = arith.constant dense<0.000000e+00> : vector<256x128xf32>
    %11 = tpu.matmul %9, %10, %cst_5 {dimension_numbers = #tpu.dot_dimension_numbers<[1], [0], [0], [1], [0, 0, 1, 1], [], []>} : vector<256x128xbf16>, vector<128x128xbf16>, vector<256x128xf32> -> vector<256x128xf32>
    %c0_6 = arith.constant 0 : index
    %c0_7 = arith.constant 0 : index
    %12 = vector.load %arg4[%c0_6, %c0_7] : memref<1x128xf32, #tpu.memory_space<vmem>>, vector<1x128xf32>
    %13 = vector.broadcast %12 : vector<1x128xf32> to vector<256x128xf32>
    %14 = arith.addf %11, %13 : vector<256x128xf32>
    %cst_8 = arith.constant 0.000000e+00 : f32
    %15 = vector.broadcast %cst_8 : f32 to vector<256x128xf32>
    %16 = arith.maximumf %14, %15 : vector<256x128xf32>
    %17 = arith.truncf %16 : vector<256x128xf32> to vector<256x128xbf16>
    %c0_9 = arith.constant 0 : index
    %c0_10 = arith.constant 0 : index
    %18 = vector.load %arg5[%c0_9, %c0_10] : memref<128x128xbf16, #tpu.memory_space<vmem>>, vector<128x128xbf16>
    %cst_11 = arith.constant dense<0.000000e+00> : vector<256x128xf32>
    %19 = tpu.matmul %17, %18, %cst_11 {dimension_numbers = #tpu.dot_dimension_numbers<[1], [0], [0], [1], [0, 0, 1, 1], [], []>} : vector<256x128xbf16>, vector<128x128xbf16>, vector<256x128xf32> -> vector<256x128xf32>
    %c0_12 = arith.constant 0 : index
    %c0_13 = arith.constant 0 : index
    %20 = vector.load %arg6[%c0_12, %c0_13] : memref<1x128xf32, #tpu.memory_space<vmem>>, vector<1x128xf32>
    %21 = vector.broadcast %20 : vector<1x128xf32> to vector<256x128xf32>
    %22 = arith.addf %19, %21 : vector<256x128xf32>
    %cst_14 = arith.constant 0.000000e+00 : f32
    %23 = vector.broadcast %cst_14 : f32 to vector<256x128xf32>
    %24 = arith.maximumf %22, %23 : vector<256x128xf32>
    %25 = arith.truncf %24 : vector<256x128xf32> to vector<256x128xbf16>
    %c0_15 = arith.constant 0 : index
    %c0_16 = arith.constant 0 : index
    %26 = vector.load %arg7[%c0_15, %c0_16] : memref<128x128xbf16, #tpu.memory_space<vmem>>, vector<128x128xbf16>
    %cst_17 = arith.constant dense<0.000000e+00> : vector<256x128xf32>
    %27 = tpu.matmul %25, %26, %cst_17 {dimension_numbers = #tpu.dot_dimension_numbers<[1], [0], [0], [1], [0, 0, 1, 1], [], []>} : vector<256x128xbf16>, vector<128x128xbf16>, vector<256x128xf32> -> vector<256x128xf32>
    %c0_18 = arith.constant 0 : index
    %c0_19 = arith.constant 0 : index
    %28 = vector.load %arg8[%c0_18, %c0_19] : memref<1x128xf32, #tpu.memory_space<vmem>>, vector<1x128xf32>
    %29 = vector.broadcast %28 : vector<1x128xf32> to vector<256x128xf32>
    %30 = arith.addf %27, %29 : vector<256x128xf32>
    %c0_20 = arith.constant 0 : index
    %c0_21 = arith.constant 0 : index
    %31 = vector.load %arg9[%c0_20, %c0_21] : memref<256x128xf32, #tpu.memory_space<vmem>>, vector<256x128xf32>
    tpu.vector_store %arg9[%c0_20, %c0_21], %30 {strides = array<i32>} : memref<256x128xf32, #tpu.memory_space<vmem>>, vector<256x128xf32>,
    return
  }
  func.func @transform_0(%arg0: i32) -> (i32, i32) {
    %c0_i32 = arith.constant 0 : i32
    %c0_i32_0 = arith.constant 0 : i32
    return %arg0, %c0_i32 : i32, i32
  }
  func.func @transform_1(%arg0: i32) -> (i32, i32) {
    %c0_i32 = arith.constant 0 : i32
    %c0_i32_0 = arith.constant 0 : i32
    %c0_i32_1 = arith.constant 0 : i32
    return %c0_i32, %c0_i32_0 : i32, i32
  }
  func.func @transform_2(%arg0: i32) -> (i32, i32) {
    %c0_i32 = arith.constant 0 : i32
    %c0_i32_0 = arith.constant 0 : i32
    %c0_i32_1 = arith.constant 0 : i32
    return %c0_i32, %c0_i32_0 : i32, i32
  }
  func.func @transform_3(%arg0: i32) -> (i32, i32) {
    %c0_i32 = arith.constant 0 : i32
    %c0_i32_0 = arith.constant 0 : i32
    %c0_i32_1 = arith.constant 0 : i32
    return %c0_i32, %c0_i32_0 : i32, i32
  }
  func.func @transform_4(%arg0: i32) -> (i32, i32) {
    %c0_i32 = arith.constant 0 : i32
    %c0_i32_0 = arith.constant 0 : i32
    %c0_i32_1 = arith.constant 0 : i32
    return %c0_i32, %c0_i32_0 : i32, i32
  }
  func.func @transform_5(%arg0: i32) -> (i32, i32) {
    %c0_i32 = arith.constant 0 : i32
    %c0_i32_0 = arith.constant 0 : i32
    %c0_i32_1 = arith.constant 0 : i32
    return %c0_i32, %c0_i32_0 : i32, i32
  }
  func.func @transform_6(%arg0: i32) -> (i32, i32) {
    %c0_i32 = arith.constant 0 : i32
    %c0_i32_0 = arith.constant 0 : i32
    %c0_i32_1 = arith.constant 0 : i32
    return %c0_i32, %c0_i32_0 : i32, i32
  }
  func.func @transform_7(%arg0: i32) -> (i32, i32) {
    %c0_i32 = arith.constant 0 : i32
    %c0_i32_0 = arith.constant 0 : i32
    %c0_i32_1 = arith.constant 0 : i32
    return %c0_i32, %c0_i32_0 : i32, i32
  }
  func.func @transform_8(%arg0: i32) -> (i32, i32) {
    %c0_i32 = arith.constant 0 : i32
    %c0_i32_0 = arith.constant 0 : i32
    return %arg0, %c0_i32 : i32, i32
  }
}

</mosaic_0001>

<bundles_post_ra>
// kernel: tpu_custom_call.1
= control target key start
LH: loop header
LB: loop body
LE: loop exit
PB: predicated region body
PF: predicated region fallthrough
CT: control target
= control target key end

     0   :  { %13 = vsyncpa [#allocation3], 0  ;;  %s3581_s0 = inlined_call_operand.vmem [shape: s32[256,1], index: 0, kind: input, shape index: {}]   ;;  %s3582_s1 = inlined_call_operand.vmem [shape: bf16[512,128], index: 1, kind: input, shape index: {}]   ;;  %s3583_s2 = inlined_call_operand.hbm [shape: bf16[128,128], index: 2, kind: input, shape index: {}]   ;;  %s3584_s3 = inlined_call_operand.vmem [shape: f32[1,128], index: 3, kind: input, shape index: {}]   ;;  %s3585_s4 = inlined_call_operand.hbm [shape: bf16[128,128], index: 4, kind: input, shape index: {}]   ;;  %s3586_s5 = inlined_call_operand.vmem [shape: f32[1,128], index: 5, kind: input, shape index: {}]   ;;  %s3587_s6 = inlined_call_operand.hbm [shape: bf16[128,128], index: 6, kind: input, shape index: {}]   ;;  %s3588_s7 = inlined_call_operand.vmem [shape: f32[1,128], index: 7, kind: input, shape index: {}]   ;;  %s3589_s8 = inlined_call_operand.hbm [shape: f32[256,128], index: 8, kind: output, shape index: {}]  }
   0x1   :  { %14 = vsyncpa [#allocation6], 0 }
   0x2   :  { %15 = vsyncpa [#allocation4], 0  ;;  %s39_s29 = sshll.u32 %s3585_s4, 4  ;;  %s2583_s30 = smov [#allocation5]   ;;  %s40_s29 = int_to_ptr.hbm [resolvable:$true] %s39_s29 }
   0x3   :  { %s41_s9 = sshll.u32 %s2583_s30, 4  ;;  %s24_s12 = sshll.u32 %s3583_s2, 4  ;;  %s42_s9 = int_to_ptr.vmem [resolvable:$true] %s41_s9  ;;  %s25_s12 = int_to_ptr.hbm [resolvable:$true] %s24_s12 }
   0x4   :  { %s2584_s13 = smov 64   ;;  %s2585_s14 = smov 4  }
   0x5   :  { %47 = dma.hbm_to_vmem [thread:$0]  %s40_s29, 1024, %s42_s9, [#allocation6], %s2584_s13, %s2584_s13, %s2585_s14  }
   0x6   :  { %s2586_s15 = smov [#allocation2]   ;;  %s54_s19 = sshll.u32 %s3587_s6, 4  ;;  %s55_s19 = int_to_ptr.hbm [resolvable:$true] %s54_s19 }
   0x7   :  { %s26_s16 = sshll.u32 %s2586_s15, 4  ;;  %s2587_s4 = smov [#allocation7]   ;;  %s27_s16 = int_to_ptr.vmem [resolvable:$true] %s26_s16 }
   0x8   :  { %32 = dma.hbm_to_vmem [thread:$0]  %s25_s12, 1024, %s27_s16, [#allocation3], %s2584_s13, %s2584_s13, %s2585_s14  }
   0x9   :  { %s56_s20 = sshll.u32 %s2587_s4, 4  ;;  %s57_s20 = int_to_ptr.vmem [resolvable:$true] %s56_s20 }
   0xa   :  { %62 = dma.hbm_to_vmem [thread:$0]  %s55_s19, 1024, %s57_s20, [#allocation6], %s2584_s13, %s2584_s13, %s2585_s14  }
   0xb   :  { %2577 = dma.done.wait [#allocation3], 1024  }
   0xc   :  { %2578 = vsyncadd [#allocation3], 4294966272 }
   0xd   :  { %2579 = dma.done.wait [#allocation6], 2048  }
   0xe   :  { %2580 = vsyncadd [#allocation6], 4294965248  ;;  %v2588_v0 = vmov 0   ;;  %v105_v1 = vld [vmem:[%s3581_s0 + $0xe0] sm:$0xff]  ;;  %v103_v2 = vld [vmem:[%s3581_s0 + $0xd0] sm:$0xff]  ;;  %v109_v59 = vlaneseq  ;;  %s1891_s26 = sshll.u32 %s3589_s8, 4  ;;  %s1892_s26 = int_to_ptr.hbm [resolvable:$true] %s1891_s26 }
   0xf   :  { %2477 = vset.pattern.permute.xlu2 %v2588_v0  ;;  %2476 = vset.pattern.permute.xlu1 %v2588_v0  ;;  %v101_v3 = vld [vmem:[%s3581_s0 + $0xc0] sm:$0xff]  ;;  %v106_v4 = vld [vmem:[%s3581_s0 + $0xe8] sm:$0xff]  ;;  %v104_v5 = vld [vmem:[%s3581_s0 + $0xd8] sm:$0xff]  ;;  %s2591_s27 = smov 128  }
  0x10   :  { %2475 = vset.pattern.permute.xlu0 %v2588_v0  ;;  %199 = vperm.xlu2 %2477, %v105_v1   ;;  %v102_v6 = vld [vmem:[%s3581_s0 + $0xc8] sm:$0xff]  ;;  %v108_v7 = vld [vmem:[%s3581_s0 + $0xf8] sm:$0xff]  ;;  %v77_v8 = vld [vmem:[%s3581_s0] sm:$0xff]  ;;  %v2845_v61 = vand.u32 127, %v109_v59 }
  0x11   :  { %193 = vperm.xlu1 %2476, %v103_v2   ;;  %187 = vperm.xlu0 %2475, %v101_v3   ;;  %v107_v9 = vld [vmem:[%s3581_s0 + $0xf0] sm:$0xff]  ;;  %v80_v11 = vld [vmem:[%s3581_s0 + $0x18] sm:$0xff]  ;;  %v78_v12 = vld [vmem:[%s3581_s0 + $0x8] sm:$0xff]  ;;  %v3590_v3 = vmov 0 }
  0x12   :  { %v79_v10 = vld [vmem:[%s3581_s0 + $0x10] sm:$0xff]  ;;  %v82_v13 = vld [vmem:[%s3581_s0 + $0x28] sm:$0xff]  ;;  %v81_v15 = vld [vmem:[%s3581_s0 + $0x20] sm:$0xff]  ;;  %v2848_v63 = vadd.s32 256, %v2845_v61  ;;  %v2851_v0 = vadd.s32 128, %v2845_v61 }
  0x13   :  { %v83_v14 = vld [vmem:[%s3581_s0 + $0x30] sm:$0xff]  ;;  %v85_v16 = vld [vmem:[%s3581_s0 + $0x40] sm:$0xff]  ;;  %v86_v17 = vld [vmem:[%s3581_s0 + $0x48] sm:$0xff] }
  0x14   :  { %v84_v18 = vld [vmem:[%s3581_s0 + $0x38] sm:$0xff]  ;;  %v89_v20 = vld [vmem:[%s3581_s0 + $0x60] sm:$0xff]  ;;  %v87_v21 = vld [vmem:[%s3581_s0 + $0x50] sm:$0xff] }
  0x15   :  { %v88_v19 = vld [vmem:[%s3581_s0 + $0x58] sm:$0xff]  ;;  %v91_v22 = vld [vmem:[%s3581_s0 + $0x70] sm:$0xff]  ;;  %v90_v24 = vld [vmem:[%s3581_s0 + $0x68] sm:$0xff] }
  0x16   :  { %v92_v23 = vld [vmem:[%s3581_s0 + $0x78] sm:$0xff]  ;;  %v94_v26 = vld [vmem:[%s3581_s0 + $0x88] sm:$0xff]  ;;  %v95_v27 = vld [vmem:[%s3581_s0 + $0x90] sm:$0xff] }
  0x17   :  { %v2392_v25 = vld [vmem:[%s3582_s1 + $0x38] sm:$0xff]  ;;  %v2391_v28 = vld [vmem:[%s3582_s1 + $0x30] sm:$0xff]  ;;  %v93_v29 = vld [vmem:[%s3581_s0 + $0x80] sm:$0xff] }
  0x18   :  { %202 = vperm.xlu2 %2477, %v106_v4   ;;  %2441 = vmatpush.bf16.msra.mxu3 %v2392_v25  ;;  %v2390_v30 = vld [vmem:[%s3582_s1 + $0x28] sm:$0xff]  ;;  %v97_v31 = vld [vmem:[%s3581_s0 + $0xa0] sm:$0xff]  ;;  %v96_v34 = vld [vmem:[%s3581_s0 + $0x98] sm:$0xff] }
  0x19   :  { %196 = vperm.xlu1 %2476, %v104_v5   ;;  %190 = vperm.xlu0 %2475, %v102_v6   ;;  %v98_v32 = vld [vmem:[%s3581_s0 + $0xa8] sm:$0xff]  ;;  %v2389_v33 = vld [vmem:[%s3582_s1 + $0x20] sm:$0xff]  ;;  %v2388_v35 = vld [vmem:[%s3582_s1 + $0x18] sm:$0xff]  ;;  %v3592_v5 = vmov 0  ;;  %v2878_v6 = vadd.s32 384, %v2845_v61 }
  0x1a   :  { %914 = vmatpush.bf16.msra.mxu0 %v2392_v25  ;;  %v2400_v36 = vld [vmem:[%s3582_s1 + $0x78] sm:$0xff]  ;;  %v2387_v39 = vld [vmem:[%s3582_s1 + $0x10] sm:$0xff]  ;;  %v2386_v43 = vld [vmem:[%s3582_s1 + $0x8] sm:$0xff] }
  0x1b   :  { %v2758_v37 = vld [vmem:[%s3582_s1 + $0xb8] sm:$0xff]  ;;  %1003 = vmatpush.bf16.msra.mxu1 %v2400_v36  ;;  %v99_v40 = vld [vmem:[%s3581_s0 + $0xb0] sm:$0xff]  ;;  %v2398_v44 = vld [vmem:[%s3582_s1 + $0x68] sm:$0xff] }
  0x1c   :  { %2442 = vmatpush.bf16.msra.mxu3 %v2391_v28  ;;  %v100_v38 = vld [vmem:[%s3581_s0 + $0xb8] sm:$0xff]  ;;  %1092 = vmatpush.bf16.msra.mxu2 %v2758_v37  ;;  %v2399_v41 = vld [vmem:[%s3582_s1 + $0x70] sm:$0xff]  ;;  %v2788_v45 = vld [vmem:[%s3582_s1 + $0xa8] sm:$0xff]  ;;  %s2592_s0 = smov 8  }
  0x1d   :  { %v2776_v42 = vld [vmem:[%s3582_s1 + $0xb0] sm:$0xff]  ;;  %v2385_v46 = vld [vmem:[%s3582_s1] sm:$0xff]  ;;  %v2396_v49 = vld [vmem:[%s3582_s1 + $0x58] sm:$0xff] }
  0x1e   :  { %915 = vmatpush.bf16.msra.mxu0 %v2391_v28  ;;  %v2397_v47 = vld [vmem:[%s3582_s1 + $0x60] sm:$0xff]  ;;  %v2809_v50 = vld [vmem:[%s3582_s1 + $0x98] sm:$0xff]  ;;  %v2395_v51 = vld [vmem:[%s3582_s1 + $0x50] sm:$0xff] }
  0x1f   :  { %1004 = vmatpush.bf16.msra.mxu1 %v2399_v41  ;;  %v2800_v48 = vld [vmem:[%s3582_s1 + $0xa0] sm:$0xff]  ;;  %v2818_v52 = vld [vmem:[%s3582_s1 + $0x90] sm:$0xff]  ;;  %v2394_v53 = vld [vmem:[%s3582_s1 + $0x48] sm:$0xff] }
  0x20   :  { %115 = vperm.xlu2 %2477, %v77_v8   ;;  %2443 = vmatpush.bf16.msra.mxu3 %v2390_v30  ;;  %v2827_v54 = vld [vmem:[%s3582_s1 + $0x88] sm:$0xff]  ;;  %v2393_v56 = vld [vmem:[%s3582_s1 + $0x40] sm:$0xff] }
  0x21   :  { %208 = vperm.xlu1 %2476, %v108_v7   ;;  %205 = vperm.xlu0 %2475, %v107_v9   ;;  %v2838_v57 = vld [vmem:[%s3582_s1 + $0x80] sm:$0xff]  ;;  %v2589_v7 = vmov 1.0|1.0  }
  0x22   :  { %916 = vmatpush.bf16.msra.mxu0 %v2390_v30  ;;  %1093 = vmatpush.bf16.msra.mxu2 %v2776_v42  ;;  %v2413_v59 = vld [vmem:[%s3582_s1 + $0xe0] sm:$0xff] }
  0x23   :  { %1005 = vmatpush.bf16.msra.mxu1 %v2398_v44  ;;  %v2409_v8 = vld [vmem:[%s3582_s1 + $0xc0] sm:$0xff] }
  0x24   :  { %2444 = vmatpush.bf16.msra.mxu3 %v2389_v33 }
  0x26   :  { %917 = vmatpush.bf16.msra.mxu0 %v2389_v33  ;;  %1094 = vmatpush.bf16.msra.mxu2 %v2788_v45 }
  0x27   :  { %1006 = vmatpush.bf16.msra.mxu1 %v2397_v47 }
  0x28   :  { %124 = vperm.xlu2 %2477, %v80_v11   ;;  %2445 = vmatpush.bf16.msra.mxu3 %v2388_v35  ;;  %v3600_v11 = vmov 0 }
  0x29   :  { %121 = vperm.xlu1 %2476, %v79_v10   ;;  %118 = vperm.xlu0 %2475, %v78_v12   ;;  %v3598_v10 = vmov 0 }
  0x2a   :  { %918 = vmatpush.bf16.msra.mxu0 %v2388_v35  ;;  %1095 = vmatpush.bf16.msra.mxu2 %v2800_v48 }
  0x2b   :  { %1007 = vmatpush.bf16.msra.mxu1 %v2396_v49 }
  0x2c   :  { %2446 = vmatpush.bf16.msra.mxu3 %v2387_v39 }
  0x2e   :  { %919 = vmatpush.bf16.msra.mxu0 %v2387_v39  ;;  %1096 = vmatpush.bf16.msra.mxu2 %v2809_v50 }
  0x2f   :  { %1008 = vmatpush.bf16.msra.mxu1 %v2395_v51 }
  0x30   :  { %133 = vperm.xlu2 %2477, %v83_v14   ;;  %2447 = vmatpush.bf16.msra.mxu3 %v2386_v43 }
  0x31   :  { %130 = vperm.xlu1 %2476, %v82_v13   ;;  %127 = vperm.xlu0 %2475, %v81_v15   ;;  %v3602_v13 = vmov 0 }
  0x32   :  { %920 = vmatpush.bf16.msra.mxu0 %v2386_v43  ;;  %1097 = vmatpush.bf16.msra.mxu2 %v2818_v52 }
  0x33   :  { %1009 = vmatpush.bf16.msra.mxu1 %v2394_v53 }
  0x34   :  { %2448 = vmatpush.bf16.msra.mxu3 %v2385_v46 }
  0x36   :  { %921 = vmatpush.bf16.msra.mxu0 %v2385_v46  ;;  %1098 = vmatpush.bf16.msra.mxu2 %v2827_v54 }
  0x37   :  { %1010 = vmatpush.bf16.msra.mxu1 %v2393_v56 }
  0x38   :  { %142 = vperm.xlu2 %2477, %v86_v17   ;;  %2449 = vmatpush.bf16.msrb.mxu3 %v2400_v36  ;;  %v3606_v17 = vmov 0  ;;  %v3622_v36 = vmov 0 }
  0x39   :  { %139 = vperm.xlu1 %2476, %v85_v16   ;;  %136 = vperm.xlu0 %2475, %v84_v18   ;;  %v3604_v16 = vmov 0  ;;  %v3608_v18 = vmov 0 }
  0x3a   :  { %1099 = vmatpush.bf16.msra.mxu2 %v2838_v57 }
  0x3c   :  { %2450 = vmatpush.bf16.msrb.mxu3 %v2399_v41 }
  0x40   :  { %151 = vperm.xlu2 %2477, %v89_v20   ;;  %2451 = vmatpush.bf16.msrb.mxu3 %v2398_v44  ;;  %v3612_v20 = vmov 0 }
  0x41   :  { %148 = vperm.xlu1 %2476, %v88_v19   ;;  %145 = vperm.xlu0 %2475, %v87_v21   ;;  %v3610_v19 = vmov 0 }
  0x44   :  { %2452 = vmatpush.bf16.msrb.mxu3 %v2397_v47 }
  0x48   :  { %160 = vperm.xlu2 %2477, %v92_v23   ;;  %2453 = vmatpush.bf16.msrb.mxu3 %v2396_v49 }
  0x49   :  { %157 = vperm.xlu1 %2476, %v91_v22   ;;  %154 = vperm.xlu0 %2475, %v90_v24   ;;  %v3614_v24 = vmov 0 }
  0x4c   :  { %2454 = vmatpush.bf16.msrb.mxu3 %v2395_v51 }
  0x50   :  { %169 = vperm.xlu2 %2477, %v95_v27   ;;  %2455 = vmatpush.bf16.msrb.mxu3 %v2394_v53  ;;  %v3616_v27 = vmov 0 }
  0x51   :  { %166 = vperm.xlu1 %2476, %v94_v26   ;;  %163 = vperm.xlu0 %2475, %v93_v29   ;;  %v3618_v29 = vmov 0 }
  0x54   :  { %2456 = vmatpush.bf16.msrb.mxu3 %v2393_v56  ;;  %v2415_v56 = vld [vmem:[%s3582_s1 + $0xf0] sm:$0xff] }
  0x58   :  { %178 = vperm.xlu2 %2477, %v98_v32  }
  0x59   :  { %175 = vperm.xlu1 %2476, %v97_v31   ;;  %172 = vperm.xlu0 %2475, %v96_v34   ;;  %v3620_v34 = vmov 0 }
  0x61   :  { %184 = vperm.xlu1 %2476, %v100_v38   ;;  %181 = vperm.xlu0 %2475, %v99_v40  }
  0x6a   :  { %v2829_v55 = vpop.permute.xlu2 %199 }
  0x6b   :  { %vm323_vm0 = vcmp.eq.s32.totalorder %v2851_v0, %v2829_v55  ;;  %vm324_vm2 = vcmp.eq.s32.totalorder %v2848_v63, %v2829_v55 }
  0x72   :  { %v2841_v58 = vpop.permute.xlu2 %202 }
  0x73   :  { %vm327_vm1 = vcmp.eq.s32.totalorder %v2851_v0, %v2841_v58  ;;  %vm328_vm3 = vcmp.eq.s32.totalorder %v2848_v63, %v2841_v58 }
  0x74   :  { %vm2863_vm4 = vmpackc.low %vm327_vm1, %vm323_vm0 }
  0x75   :  { %v3591_v3 = vsel %vm2863_vm4, 4294967295, %v3590_v3  ;;  %vm2868_vm6 = vmpackc.low %vm328_vm3, %vm324_vm2 }
  0x76   :  { %v3593_v5 = vsel %vm2868_vm6, 4294967295, %v3592_v5 }
  0x7a   :  { %v2853_v1 = vpop.permute.xlu2 %115 }
  0x82   :  { %v2919_v14 = vpop.permute.xlu2 %124 }
  0x83   :  { %v2843_v60 = vpop.permute.xlu1 %193  ;;  %v188_v62 = vpop.permute.xlu0 %187 }
  0x84   :  { %vm306_vm5 = vcmp.eq.s32.totalorder %v2845_v61, %v188_v62  ;;  %vm315_vm9 = vcmp.eq.s32.totalorder %v2851_v0, %v2843_v60  ;;  %vm307_vm13 = vcmp.eq.s32.totalorder %v2851_v0, %v188_v62  ;;  %vm316_vm15 = vcmp.eq.s32.totalorder %v2848_v63, %v2843_v60 }
  0x85   :  { %vm308_vm1 = vcmp.eq.s32.totalorder %v2848_v63, %v188_v62 }
  0x8a   :  { %v2970_v23 = vpop.permute.xlu2 %133 }
  0x8b   :  { %v197_v2 = vpop.permute.xlu1 %196  ;;  %v191_v4 = vpop.permute.xlu0 %190 }
  0x8c   :  { %vm310_vm7 = vcmp.eq.s32.totalorder %v2845_v61, %v191_v4  ;;  %vm311_vm8 = vcmp.eq.s32.totalorder %v2851_v0, %v191_v4  ;;  %vm319_vm10 = vcmp.eq.s32.totalorder %v2851_v0, %v197_v2  ;;  %vm312_vm11 = vcmp.eq.s32.totalorder %v2848_v63, %v191_v4 }
  0x8d   :  { %vm2185_vm12 = vmpackc.low %vm310_vm7, %vm306_vm5  ;;  %vm320_vm0 = vcmp.eq.s32.totalorder %v2848_v63, %v197_v2  ;;  %vm313_vm3 = vcmp.eq.s32.totalorder %v2878_v6, %v191_v4  ;;  %vm317_vm7 = vcmp.eq.s32.totalorder %v2878_v6, %v2843_v60 }
  0x8e   :  { %2186 = vmatmul.msk.bf16.vlgmr.msra.gmra.mxu3 %vm2185_vm12, %v2589_v7  ;;  %vm2883_vm14 = vmpackc.low %vm311_vm8, %vm307_vm13  ;;  %vm321_vm8 = vcmp.eq.s32.totalorder %v2878_v6, %v197_v2 }
  0x8f   :  { %2457 = vmatpush.bf16.msra.mxu3 %v2758_v37  ;;  %vm2892_vm2 = vmpackc.low %vm319_vm10, %vm315_vm9  ;;  %vm309_vm9 = vcmp.eq.s32.totalorder %v2878_v6, %v188_v62  ;;  %vm325_vm10 = vcmp.eq.s32.totalorder %v2878_v6, %v2829_v55  ;;  %v3624_v37 = vmov 0  ;;  %v2412_v62 = vld [vmem:[%s3582_s1 + $0xd8] sm:$0xff] }
  0x90   :  { %vm2897_vm5 = vmpackc.low %vm312_vm11, %vm308_vm1  ;;  %vm329_vm11 = vcmp.eq.s32.totalorder %v2878_v6, %v2841_v58 }
  0x91   :  { %v3599_v10 = vsel %vm2897_vm5, 4294967295, %v3598_v10  ;;  %vm2904_vm12 = vmpackc.low %vm320_vm0, %vm316_vm15 }
  0x92   :  { %v3601_v11 = vsel %vm2904_vm12, 4294967295, %v3600_v11  ;;  %vm2915_vm13 = vmpackc.low %vm313_vm3, %vm309_vm9  ;;  %vm212_vm12 = vcmp.eq.s32.totalorder %v2848_v63, %v2853_v1  ;;  %v2994_v28 = vpop.permute.xlu2 %142 }
  0x93   :  { %v2913_v12 = vpop.permute.xlu1 %208  ;;  %v3603_v13 = vsel %vm2915_vm13, 4294967295, %v3602_v13  ;;  %v2921_v15 = vpop.permute.xlu0 %205  ;;  %2458 = vmatpush.bf16.msra.mxu3 %v2776_v42  ;;  %vm2924_vm15 = vmpackc.low %vm321_vm8, %vm317_vm7 }
  0x94   :  { %v3605_v16 = vsel %vm2924_vm15, 4294967295, %v3604_v16  ;;  %vm331_vm0 = vcmp.eq.s32.totalorder %v2851_v0, %v2921_v15  ;;  %vm335_vm1 = vcmp.eq.s32.totalorder %v2851_v0, %v2913_v12  ;;  %vm332_vm3 = vcmp.eq.s32.totalorder %v2848_v63, %v2921_v15  ;;  %vm2934_vm9 = vmpackc.low %vm329_vm11, %vm325_vm10 }
  0x95   :  { %v3607_v17 = vsel %vm2934_vm9, 4294967295, %v3606_v17  ;;  %vm336_vm13 = vcmp.eq.s32.totalorder %v2848_v63, %v2913_v12  ;;  %vm333_vm7 = vcmp.eq.s32.totalorder %v2878_v6, %v2921_v15  ;;  %vm337_vm8 = vcmp.eq.s32.totalorder %v2878_v6, %v2913_v12  ;;  %vm2944_vm15 = vmpackc.low %vm335_vm1, %vm331_vm0 }
  0x96   :  { %v3609_v18 = vsel %vm2944_vm15, 4294967295, %v3608_v18  ;;  %vm2949_vm6 = vmpackc.low %vm336_vm13, %vm332_vm3  ;;  %vm314_vm11 = vcmp.eq.s32.totalorder %v2845_v61, %v2843_v60  ;;  %vm318_vm9 = vcmp.eq.s32.totalorder %v2845_v61, %v197_v2  ;;  %vm213_vm0 = vcmp.eq.s32.totalorder %v2878_v6, %v2853_v1  ;;  %v2423_v2 = vld [vmem:[#allocation2 + $0x30] sm:$0xff] }
  0x97   :  { %2459 = vmatpush.bf16.msra.mxu3 %v2788_v45  ;;  %v3611_v19 = vsel %vm2949_vm6, 4294967295, %v3610_v19  ;;  %vm2953_vm10 = vmpackc.low %vm337_vm8, %vm333_vm7  ;;  %vm210_vm13 = vcmp.eq.s32.totalorder %v2845_v61, %v2853_v1  ;;  %vm211_vm8 = vcmp.eq.s32.totalorder %v2851_v0, %v2853_v1  ;;  %v2411_v1 = vld [vmem:[%s3582_s1 + $0xd0] sm:$0xff] }
  0x98   :  { %v3613_v20 = vsel %vm2953_vm10, 4294967295, %v3612_v20  ;;  %vm2187_vm7 = vmpackc.low %vm318_vm9, %vm314_vm11 }
  0x9a   :  { %v3026_v32 = vpop.permute.xlu2 %151 }
  0x9b   :  { %v122_v21 = vpop.permute.xlu1 %121  ;;  %v119_v22 = vpop.permute.xlu0 %118  ;;  %2460 = vmatpush.bf16.msra.mxu3 %v2800_v48 }
  0x9c   :  { %vm217_vm1 = vcmp.eq.s32.totalorder %v2878_v6, %v119_v22  ;;  %vm214_vm3 = vcmp.eq.s32.totalorder %v2845_v61, %v119_v22  ;;  %vm215_vm10 = vcmp.eq.s32.totalorder %v2851_v0, %v119_v22  ;;  %vm216_vm5 = vcmp.eq.s32.totalorder %v2848_v63, %v119_v22 }
  0x9d   :  { %vm2972_vm6 = vmpackc.low %vm217_vm1, %vm213_vm0  ;;  %vm221_vm0 = vcmp.eq.s32.totalorder %v2878_v6, %v122_v21  ;;  %vm225_vm1 = vcmp.eq.s32.totalorder %v2878_v6, %v2919_v14 }
  0x9e   :  { %v3615_v24 = vsel %vm2972_vm6, 4294967295, %v3614_v24  ;;  %vm2161_vm15 = vmpackc.low %vm214_vm3, %vm210_vm13  ;;  %2188 = vmatmul.msk.bf16.gmra.mxu3 %vm2187_vm7, %v2589_v7  ;;  %vm326_vm3 = vcmp.eq.s32.totalorder %v2845_v61, %v2841_v58  ;;  %vm218_vm7 = vcmp.eq.s32.totalorder %v2845_v61, %v122_v21  ;;  %v2424_v58 = vld [vmem:[#allocation2 + $0x38] sm:$0xff] }
  0x9f   :  { %2162 = vmatmul.msk.bf16.vlgmr.msra.gmra.mxu0 %vm2161_vm15, %v2589_v7  ;;  %vm2193_vm9 = vmpackc.low %vm215_vm10, %vm211_vm8  ;;  %2461 = vmatpush.bf16.msra.mxu3 %v2809_v50  ;;  %vm222_vm8 = vcmp.eq.s32.totalorder %v2845_v61, %v2919_v14 }
  0xa0   :  { %2194 = vmatmul.msk.bf16.vlgmr.msra.gmra.mxu1 %vm2193_vm9, %v2589_v7  ;;  %vm2225_vm11 = vmpackc.low %vm216_vm5, %vm212_vm12  ;;  %vm322_vm12 = vcmp.eq.s32.totalorder %v2845_v61, %v2829_v55  ;;  %vm219_vm9 = vcmp.eq.s32.totalorder %v2851_v0, %v122_v21  ;;  %v2416_v55 = vld [vmem:[%s3582_s1 + $0xf8] sm:$0xff]  ;;  %1354 = vmatpush.bf16.msrb.mxu0 %v2424_v58  ;;  %v2417_v58 = vld [vmem:[#allocation2] sm:$0xff] }
  0xa1   :  { %2226 = vmatmul.msk.bf16.vlgmr.msra.gmra.mxu2 %vm2225_vm11, %v2589_v7  ;;  %vm2988_vm13 = vmpackc.low %vm225_vm1, %vm221_vm0  ;;  %vm223_vm11 = vcmp.eq.s32.totalorder %v2851_v0, %v2919_v14  ;;  %vm220_vm1 = vcmp.eq.s32.totalorder %v2848_v63, %v122_v21 }
  0xa2   :  { %v3617_v27 = vsel %vm2988_vm13, 4294967295, %v3616_v27  ;;  %vm2189_vm0 = vmpackc.low %vm326_vm3, %vm322_vm12  ;;  %vm237_vm3 = vcmp.eq.s32.totalorder %v2878_v6, %v2970_v23  ;;  %v3059_v39 = vpop.permute.xlu2 %160 }
  0xa3   :  { %v131_v25 = vpop.permute.xlu1 %130  ;;  %v128_v26 = vpop.permute.xlu0 %127  ;;  %2462 = vmatpush.bf16.msra.mxu3 %v2818_v52 }
  0xa4   :  { %vm229_vm15 = vcmp.eq.s32.totalorder %v2878_v6, %v128_v26  ;;  %vm233_vm10 = vcmp.eq.s32.totalorder %v2878_v6, %v131_v25  ;;  %1355 = vmatpush.bf16.msrb.mxu0 %v2423_v2 }
  0xa5   :  { %vm2997_vm5 = vmpackc.low %vm233_vm10, %vm229_vm15  ;;  %vm224_vm15 = vcmp.eq.s32.totalorder %v2848_v63, %v2919_v14  ;;  %v2421_v14 = vld [vmem:[#allocation2 + $0x20] sm:$0xff] }
  0xa6   :  { %v3619_v29 = vsel %vm2997_vm5, 4294967295, %v3618_v29  ;;  %vm2163_vm10 = vmpackc.low %vm222_vm8, %vm218_vm7 }
  0xa7   :  { %2463 = vmatpush.bf16.msra.mxu3 %v2827_v54  ;;  %vm2195_vm5 = vmpackc.low %vm223_vm11, %vm219_vm9 }
  0xa8   :  { %vm2227_vm6 = vmpackc.low %vm224_vm15, %vm220_vm1  ;;  %vm226_vm1 = vcmp.eq.s32.totalorder %v2845_v61, %v128_v26  ;;  %vm230_vm15 = vcmp.eq.s32.totalorder %v2845_v61, %v131_v25 }
  0xaa   :  { %v3093_v45 = vpop.permute.xlu2 %169 }
  0xab   :  { %v3001_v30 = vpop.permute.xlu1 %139  ;;  %v3007_v31 = vpop.permute.xlu0 %136  ;;  %2464 = vmatpush.bf16.msra.mxu3 %v2838_v57  ;;  %v2414_v57 = vld [vmem:[%s3582_s1 + $0xe8] sm:$0xff] }
  0xac   :  { %vm241_vm13 = vcmp.eq.s32.totalorder %v2878_v6, %v3007_v31  ;;  %vm245_vm12 = vcmp.eq.s32.totalorder %v2878_v6, %v3001_v30 }
  0xad   :  { %vm3033_vm7 = vmpackc.low %vm241_vm13, %vm237_vm3  ;;  %vm330_vm13 = vcmp.eq.s32.totalorder %v2845_v61, %v2921_v15 }
  0xae   :  { %2190 = vmatmul.msk.bf16.gmra.mxu3 %vm2189_vm0, %v2589_v7  ;;  %v3621_v34 = vsel %vm3033_vm7, 4294967295, %v3620_v34  ;;  %vm334_vm0 = vcmp.eq.s32.totalorder %v2845_v61, %v2913_v12 }
  0xaf   :  { %2164 = vmatmul.msk.bf16.gmra.mxu0 %vm2163_vm10, %v2589_v7  ;;  %vm227_vm10 = vcmp.eq.s32.totalorder %v2851_v0, %v128_v26  ;;  %vm2191_vm3 = vmpackc.low %vm334_vm0, %vm330_vm13  ;;  %vm261_vm13 = vcmp.eq.s32.totalorder %v2878_v6, %v3026_v32 }
  0xb0   :  { %2196 = vmatmul.msk.bf16.gmra.mxu1 %vm2195_vm5, %v2589_v7  ;;  %vm249_vm5 = vcmp.eq.s32.totalorder %v2878_v6, %v2994_v28 }
  0xb1   :  { %2228 = vmatmul.msk.bf16.gmra.mxu2 %vm2227_vm6, %v2589_v7  ;;  %vm3041_vm8 = vmpackc.low %vm249_vm5, %vm245_vm12  ;;  %vm231_vm12 = vcmp.eq.s32.totalorder %v2851_v0, %v131_v25  ;;  %vm228_vm5 = vcmp.eq.s32.totalorder %v2848_v63, %v128_v26 }
  0xb2   :  { %v3623_v36 = vsel %vm3041_vm8, 4294967295, %v3622_v36  ;;  %v3120_v49 = vpop.permute.xlu2 %178 }
  0xb3   :  { %v3031_v33 = vpop.permute.xlu1 %148  ;;  %v3039_v35 = vpop.permute.xlu0 %145 }
  0xb4   :  { %vm253_vm6 = vcmp.eq.s32.totalorder %v2878_v6, %v3039_v35  ;;  %vm257_vm9 = vcmp.eq.s32.totalorder %v2878_v6, %v3031_v33 }
  0xb5   :  { %vm3049_vm11 = vmpackc.low %vm257_vm9, %vm253_vm6  ;;  %vm232_vm6 = vcmp.eq.s32.totalorder %v2848_v63, %v131_v25 }
  0xb6   :  { %v3625_v37 = vsel %vm3049_vm11, 4294967295, %v3624_v37  ;;  %vm2165_vm9 = vmpackc.low %vm230_vm15, %vm226_vm1  ;;  %vm273_vm1 = vcmp.eq.s32.totalorder %v2878_v6, %v3059_v39 }
  0xb7   :  { %vm2197_vm11 = vmpackc.low %vm231_vm12, %vm227_vm10  ;;  %vm239_vm10 = vcmp.eq.s32.totalorder %v2851_v0, %v3007_v31  ;;  %vm234_vm12 = vcmp.eq.s32.totalorder %v2845_v61, %v2970_v23 }
  0xb8   :  { %vm2229_vm7 = vmpackc.low %vm232_vm6, %vm228_vm5  ;;  %vm235_vm6 = vcmp.eq.s32.totalorder %v2851_v0, %v2970_v23 }
  0xbb   :  { %v3053_v38 = vpop.permute.xlu1 %157  ;;  %v3061_v40 = vpop.permute.xlu0 %154 }
  0xbc   :  { %vm265_vm8 = vcmp.eq.s32.totalorder %v2878_v6, %v3061_v40  ;;  %vm269_vm4 = vcmp.eq.s32.totalorder %v2878_v6, %v3053_v38 }
  0xbd   :  { %vm3081_vm0 = vmpackc.low %vm265_vm8, %vm261_vm13  ;;  %vm236_vm13 = vcmp.eq.s32.totalorder %v2848_v63, %v2970_v23 }
  0xbe   :  { %2192 = vmatmul.msk.bf16.gmra.mxu3 %vm2191_vm3, %v2589_v7  ;;  %vm240_vm3 = vcmp.eq.s32.totalorder %v2848_v63, %v3007_v31 }
  0xbf   :  { %2166 = vmatmul.msk.bf16.gmra.mxu0 %vm2165_vm9, %v2589_v7  ;;  %vm2199_vm9 = vmpackc.low %vm239_vm10, %vm235_vm6 }
  0xc0   :  { %2198 = vmatmul.msk.bf16.gmra.mxu1 %vm2197_vm11, %v2589_v7  ;;  %vm3089_vm11 = vmpackc.low %vm273_vm1, %vm269_vm4  ;;  %vm238_vm4 = vcmp.eq.s32.totalorder %v2845_v61, %v3007_v31 }
  0xc1   :  { %2230 = vmatmul.msk.bf16.gmra.mxu2 %vm2229_vm7, %v2589_v7  ;;  %vm2167_vm5 = vmpackc.low %vm238_vm4, %vm234_vm12  ;;  %vm297_vm4 = vcmp.eq.s32.totalorder %v2878_v6, %v3120_v49 }
  0xc3   :  { %v3079_v41 = vpop.permute.xlu1 %166  ;;  %v3087_v43 = vpop.permute.xlu0 %163 }
  0xc4   :  { %vm277_vm7 = vcmp.eq.s32.totalorder %v2878_v6, %v3087_v43  ;;  %vm281_vm8 = vcmp.eq.s32.totalorder %v2878_v6, %v3079_v41 }
  0xc5   :  { %vm3099_vm15 = vmpackc.low %vm281_vm8, %vm277_vm7 }
  0xc6   :  { %vm2231_vm7 = vmpackc.low %vm240_vm3, %vm236_vm13  ;;  %vm243_vm13 = vcmp.eq.s32.totalorder %v2851_v0, %v3001_v30 }
  0xcb   :  { %v3103_v47 = vpop.permute.xlu1 %175  ;;  %v3105_v48 = vpop.permute.xlu0 %172 }
  0xcc   :  { %vm289_vm1 = vcmp.eq.s32.totalorder %v2878_v6, %v3105_v48  ;;  %vm293_vm8 = vcmp.eq.s32.totalorder %v2878_v6, %v3103_v47 }
  0xcd   :  { %vm3143_vm12 = vmpackc.low %vm297_vm4, %vm293_vm8 }
  0xce   :  { %2218 = vmatmul.msk.bf16.vlgmr.msrb.gmra.mxu3 %vm2883_vm14, %v2589_v7  ;;  %vm285_vm14 = vcmp.eq.s32.totalorder %v2878_v6, %v3093_v45 }
  0xcf   :  { %2168 = vmatmul.msk.bf16.gmra.mxu0 %vm2167_vm5, %v2589_v7  ;;  %vm3137_vm10 = vmpackc.low %vm289_vm1, %vm285_vm14  ;;  %vm246_vm1 = vcmp.eq.s32.totalorder %v2845_v61, %v2994_v28  ;;  %vm247_vm14 = vcmp.eq.s32.totalorder %v2851_v0, %v2994_v28  ;;  %1181 = vmatpush.bf16.msrb.mxu3 %v2416_v55 }
  0xd0   :  { %2200 = vmatmul.msk.bf16.gmra.mxu1 %vm2199_vm9, %v2589_v7  ;;  %vm242_vm9 = vcmp.eq.s32.totalorder %v2845_v61, %v3001_v30  ;;  %vm2201_vm4 = vmpackc.low %vm247_vm14, %vm243_vm13  ;;  %vm255_vm13 = vcmp.eq.s32.totalorder %v2851_v0, %v3031_v33 }
  0xd1   :  { %2232 = vmatmul.msk.bf16.gmra.mxu2 %vm2231_vm7, %v2589_v7  ;;  %vm244_vm7 = vcmp.eq.s32.totalorder %v2848_v63, %v3001_v30  ;;  %vm2169_vm8 = vmpackc.low %vm246_vm1, %vm242_vm9  ;;  %vm250_vm9 = vcmp.eq.s32.totalorder %v2845_v61, %v3039_v35  ;;  %vm254_vm1 = vcmp.eq.s32.totalorder %v2845_v61, %v3031_v33  ;;  %v2419_v30 = vld [vmem:[#allocation2 + $0x10] sm:$0xff] }
  0xd2   :  { %vm2171_vm14 = vmpackc.low %vm254_vm1, %vm250_vm9  ;;  %vm262_vm9 = vcmp.eq.s32.totalorder %v2845_v61, %v3061_v40  ;;  %vm263_vm1 = vcmp.eq.s32.totalorder %v2851_v0, %v3061_v40 }
  0xd3   :  { %v3135_v50 = vpop.permute.xlu1 %184  ;;  %v3141_v52 = vpop.permute.xlu0 %181  ;;  %1182 = vmatpush.bf16.msrb.mxu3 %v2415_v56 }
  0xd4   :  { %vm305_vm3 = vcmp.eq.s32.totalorder %v2878_v6, %v3135_v50  ;;  %vm301_vm5 = vcmp.eq.s32.totalorder %v2878_v6, %v3141_v52  ;;  %v2410_v6 = vld [vmem:[%s3582_s1 + $0xc8] sm:$0xff] }
  0xd5   :  { %vm3151_vm6 = vmpackc.low %vm305_vm3, %vm301_vm5  ;;  %vm248_vm3 = vcmp.eq.s32.totalorder %v2848_v63, %v2994_v28 }
  0xd6   :  { %vm2233_vm5 = vmpackc.low %vm248_vm3, %vm244_vm7  ;;  %vm256_vm7 = vcmp.eq.s32.totalorder %v2848_v63, %v3031_v33 }
  0xd7   :  { %1183 = vmatpush.bf16.msrb.mxu3 %v2414_v57  ;;  %v2431_v57 = vld [vmem:[#allocation5 + $0x30] sm:$0xff] }
  0xdb   :  { %1184 = vmatpush.bf16.msrb.mxu3 %v2413_v59 }
  0xde   :  { %2220 = vmatmul.msk.bf16.gmra.mxu3 %vm2892_vm2, %v2589_v7  ;;  %vm251_vm2 = vcmp.eq.s32.totalorder %v2851_v0, %v3039_v35 }
  0xdf   :  { %2170 = vmatmul.msk.bf16.gmra.mxu0 %vm2169_vm8, %v2589_v7  ;;  %vm252_vm8 = vcmp.eq.s32.totalorder %v2848_v63, %v3039_v35  ;;  %vm2203_vm3 = vmpackc.low %vm255_vm13, %vm251_vm2  ;;  %vm258_vm2 = vcmp.eq.s32.totalorder %v2845_v61, %v3026_v32  ;;  %vm264_vm13 = vcmp.eq.s32.totalorder %v2848_v63, %v3061_v40  ;;  %1185 = vmatpush.bf16.msrb.mxu3 %v2412_v62 }
  0xe0   :  { %2202 = vmatmul.msk.bf16.gmra.mxu1 %vm2201_vm4, %v2589_v7  ;;  %vm3638_vm4 = vnez %v3591_v3 }
  0xe1   :  { %2234 = vmatmul.msk.bf16.gmra.mxu2 %vm2233_vm5, %v2589_v7  ;;  %vm2235_vm5 = vmpackc.low %vm256_vm7, %vm252_vm8  ;;  %vm259_vm7 = vcmp.eq.s32.totalorder %v2851_v0, %v3026_v32 }
  0xe2   :  { %vm2173_vm8 = vmpackc.low %vm262_vm9, %vm258_vm2  ;;  %vm266_vm9 = vcmp.eq.s32.totalorder %v2845_v61, %v3053_v38  ;;  %vm270_vm2 = vcmp.eq.s32.totalorder %v2845_v61, %v3059_v39 }
  0xe3   :  { %1186 = vmatpush.bf16.msrb.mxu3 %v2411_v1 }
  0xe7   :  { %1187 = vmatpush.bf16.msrb.mxu3 %v2410_v6 }
  0xeb   :  { %1188 = vmatpush.bf16.msrb.mxu3 %v2409_v8 }
  0xee   :  { %2222 = vmatmul.msk.bf16.gmra.mxu3 %vm3638_vm4, %v2589_v7  ;;  %vm2205_vm4 = vmpackc.low %vm263_vm1, %vm259_vm7  ;;  %vm267_vm1 = vcmp.eq.s32.totalorder %v2851_v0, %v3053_v38  ;;  %vm271_vm7 = vcmp.eq.s32.totalorder %v2851_v0, %v3059_v39 }
  0xef   :  { %2172 = vmatmul.msk.bf16.gmra.mxu0 %vm2171_vm14, %v2589_v7  ;;  %vm3639_vm14 = vnez %v3609_v18 }
  0xf0   :  { %2204 = vmatmul.msk.bf16.gmra.mxu1 %vm2203_vm3, %v2589_v7  ;;  %vm260_vm3 = vcmp.eq.s32.totalorder %v2848_v63, %v3026_v32 }
  0xf1   :  { %2236 = vmatmul.msk.bf16.gmra.mxu2 %vm2235_vm5, %v2589_v7  ;;  %vm2237_vm5 = vmpackc.low %vm264_vm13, %vm260_vm3  ;;  %vm268_vm13 = vcmp.eq.s32.totalorder %v2848_v63, %v3053_v38  ;;  %vm272_vm3 = vcmp.eq.s32.totalorder %v2848_v63, %v3059_v39 }
  0xfe   :  { %2224 = vmatmul.msk.bf16.gmra.mxu3 %vm3639_vm14, %v2589_v7  ;;  %vm3640_vm14 = vnez %v3599_v10 }
  0xff   :  { %2174 = vmatmul.msk.bf16.gmra.mxu0 %vm2173_vm8, %v2589_v7  ;;  %vm2175_vm8 = vmpackc.low %vm270_vm2, %vm266_vm9  ;;  %vm274_vm9 = vcmp.eq.s32.totalorder %v2845_v61, %v3087_v43  ;;  %vm275_vm2 = vcmp.eq.s32.totalorder %v2851_v0, %v3087_v43 }
 0x100   :  { %2206 = vmatmul.msk.bf16.gmra.mxu1 %vm2205_vm4, %v2589_v7  ;;  %vm2207_vm4 = vmpackc.low %vm271_vm7, %vm267_vm1  ;;  %vm278_vm1 = vcmp.eq.s32.totalorder %v2845_v61, %v3079_v41  ;;  %vm280_vm7 = vcmp.eq.s32.totalorder %v2848_v63, %v3079_v41 }
 0x101   :  { %2238 = vmatmul.msk.bf16.gmra.mxu2 %vm2237_vm5, %v2589_v7  ;;  %vm2239_vm5 = vmpackc.low %vm272_vm3, %vm268_vm13  ;;  %vm279_vm13 = vcmp.eq.s32.totalorder %v2851_v0, %v3079_v41  ;;  %v2432_v41 = vld [vmem:[#allocation5 + $0x38] sm:$0xff] }
 0x102   :  { %vm2209_vm3 = vmpackc.low %vm279_vm13, %vm275_vm2  ;;  %vm282_vm2 = vcmp.eq.s32.totalorder %v2845_v61, %v3093_v45  ;;  %vm288_vm13 = vcmp.eq.s32.totalorder %v2848_v63, %v3105_v48  ;;  %1559 = vmatpush.bf16.msrb.mxu1 %v2432_v41 }
 0x106   :  { %1560 = vmatpush.bf16.msrb.mxu1 %v2431_v57 }
 0x10e   :  { %2250 = vmatmul.msk.bf16.vlgmr.msra.gmra.mxu3 %vm3640_vm14, %v2589_v7  ;;  %vm2177_vm14 = vmpackc.low %vm278_vm1, %vm274_vm9  ;;  %vm286_vm9 = vcmp.eq.s32.totalorder %v2845_v61, %v3105_v48  ;;  %vm287_vm1 = vcmp.eq.s32.totalorder %v2851_v0, %v3105_v48 }
 0x10f   :  { %2176 = vmatmul.msk.bf16.gmra.mxu0 %vm2175_vm8, %v2589_v7  ;;  %vm276_vm8 = vcmp.eq.s32.totalorder %v2848_v63, %v3087_v43  ;;  %v2418_v43 = vld [vmem:[#allocation2 + $0x8] sm:$0xff] }
 0x110   :  { %2208 = vmatmul.msk.bf16.gmra.mxu1 %vm2207_vm4, %v2589_v7  ;;  %vm3641_vm4 = vnez %v3601_v11  ;;  %v2422_v11 = vld [vmem:[#allocation2 + $0x28] sm:$0xff] }
 0x111   :  { %2240 = vmatmul.msk.bf16.gmra.mxu2 %vm2239_vm5, %v2589_v7  ;;  %v3239_v60 = vpop.f32.mrf.mxu3  ;;  %vm2241_vm5 = vmpackc.low %vm280_vm7, %vm276_vm8  ;;  %vm283_vm7 = vcmp.eq.s32.totalorder %v2851_v0, %v3093_v45  ;;  %1356 = vmatpush.bf16.msrb.mxu0 %v2422_v11 }
 0x112   :  { %vm2179_vm8 = vmpackc.low %vm286_vm9, %vm282_vm2  ;;  %vm290_vm9 = vcmp.eq.s32.totalorder %v2845_v61, %v3103_v47  ;;  %vm291_vm2 = vcmp.eq.s32.totalorder %v2851_v0, %v3103_v47 }
 0x115   :  { %1357 = vmatpush.bf16.msrb.mxu0 %v2421_v14  ;;  %v2430_v14 = vld [vmem:[#allocation5 + $0x28] sm:$0xff] }
 0x116   :  { %1561 = vmatpush.bf16.msrb.mxu1 %v2430_v14 }
 0x119   :  { %v3247_v3 = vpop.f32.mrf.mxu3 }
 0x11c   :  { %v3332_v25 = vpop.f32.mrf.mxu0 }
 0x11e   :  { %2252 = vmatmul.msk.bf16.gmra.mxu3 %vm3641_vm4, %v2589_v7  ;;  %vm2211_vm4 = vmpackc.low %vm287_vm1, %vm283_vm7  ;;  %vm294_vm1 = vcmp.eq.s32.totalorder %v2845_v61, %v3120_v49 }
 0x11f   :  { %2178 = vmatmul.msk.bf16.gmra.mxu0 %vm2177_vm14, %v2589_v7  ;;  %vm3642_vm14 = vnez %v3593_v5  ;;  %vm2181_vm7 = vmpackc.low %vm294_vm1, %vm290_vm9  ;;  %vm298_vm9 = vcmp.eq.s32.totalorder %v2845_v61, %v3141_v52  ;;  %vm302_vm1 = vcmp.eq.s32.totalorder %v2845_v61, %v3135_v50 }
 0x120   :  { %2210 = vmatmul.msk.bf16.gmra.mxu1 %vm2209_vm3, %v2589_v7  ;;  %vm284_vm3 = vcmp.eq.s32.totalorder %v2848_v63, %v3093_v45 }
 0x121   :  { %2242 = vmatmul.msk.bf16.gmra.mxu2 %vm2241_vm5, %v2589_v7  ;;  %v988_v4 = vpop.f32.mrf.mxu3  ;;  %vm2243_vm5 = vmpackc.low %vm288_vm13, %vm284_vm3  ;;  %vm295_vm13 = vcmp.eq.s32.totalorder %v2851_v0, %v3120_v49  ;;  %vm296_vm3 = vcmp.eq.s32.totalorder %v2848_v63, %v3120_v49 }
 0x124   :  { %v3337_v31 = vpop.f32.mrf.mxu0 }
 0x129   :  { %v990_v9 = vpop.f32.mrf.mxu3 }
 0x12c   :  { %v3342_v33 = vpop.f32.mrf.mxu0 }
 0x12e   :  { %2254 = vmatmul.msk.bf16.gmra.mxu3 %vm3642_vm14, %v2589_v7  ;;  %vm3643_vm14 = vnez %v3611_v19 }
 0x12f   :  { %2180 = vmatmul.msk.bf16.gmra.mxu0 %vm2179_vm8, %v2589_v7  ;;  %vm292_vm8 = vcmp.eq.s32.totalorder %v2848_v63, %v3103_v47 }
 0x130   :  { %2212 = vmatmul.msk.bf16.gmra.mxu1 %vm2211_vm4, %v2589_v7  ;;  %vm2213_vm4 = vmpackc.low %vm295_vm13, %vm291_vm2  ;;  %vm299_vm2 = vcmp.eq.s32.totalorder %v2851_v0, %v3141_v52  ;;  %vm304_vm13 = vcmp.eq.s32.totalorder %v2848_v63, %v3135_v50 }
 0x131   :  { %2244 = vmatmul.msk.bf16.gmra.mxu2 %vm2243_vm5, %v2589_v7  ;;  %v993_v10 = vpop.f32.mrf.mxu3  ;;  %vm2245_vm5 = vmpackc.low %vm296_vm3, %vm292_vm8  ;;  %vm300_vm8 = vcmp.eq.s32.totalorder %v2848_v63, %v3141_v52  ;;  %v2420_v63 = vld [vmem:[#allocation2 + $0x18] sm:$0xff]  ;;  %v1101_v52 = vpop.f32.mrf.mxu2 }
 0x132   :  { %1358 = vmatpush.bf16.msrb.mxu0 %v2420_v63 }
 0x136   :  { %1359 = vmatpush.bf16.msrb.mxu0 %v2419_v30 }
 0x139   :  { %v995_v12 = vpop.f32.mrf.mxu3 }
 0x13a   :  { %1360 = vmatpush.bf16.msrb.mxu0 %v2418_v43 }
 0x13e   :  { %2256 = vmatmul.msk.bf16.gmra.mxu3 %vm3643_vm14, %v2589_v7  ;;  %vm2183_vm14 = vmpackc.low %vm302_vm1, %vm298_vm9  ;;  %vm3645_vm9 = vnez %v3617_v27  ;;  %vm3646_vm1 = vnez %v3619_v29  ;;  %v3344_v29 = vpop.f32.mrf.mxu0  ;;  %1361 = vmatpush.bf16.msrb.mxu0 %v2417_v58 }
 0x13f   :  { %2182 = vmatmul.msk.bf16.gmra.mxu0 %vm2181_vm7, %v2589_v7  ;;  %vm303_vm7 = vcmp.eq.s32.totalorder %v2851_v0, %v3135_v50  ;;  %v1012_v50 = vpop.f32.mrf.mxu1 }
 0x140   :  { %2214 = vmatmul.msk.bf16.gmra.mxu1 %vm2213_vm4, %v2589_v7  ;;  %vm3644_vm4 = vnez %v3615_v24  ;;  %vm2215_vm3 = vmpackc.low %vm303_vm7, %vm299_vm2  ;;  %vm3647_vm2 = vnez %v3621_v34  ;;  %vm3648_vm7 = vnez %v3623_v36 }
 0x141   :  { %2246 = vmatmul.msk.bf16.gmra.mxu2 %vm2245_vm5, %v2589_v7  ;;  %v998_v5 = vpop.f32.mrf.mxu3  ;;  %vm2247_vm5 = vmpackc.low %vm304_vm13, %vm300_vm8  ;;  %vm3649_vm8 = vnez %v3625_v37 }
 0x146   :  { %v3351_v34 = vpop.f32.mrf.mxu0 }
 0x147   :  { %v1014_v59 = vpop.f32.mrf.mxu1 }
 0x149   :  { %v1000_v15 = vpop.f32.mrf.mxu3 }
 0x14e   :  { %2258 = vmatmul.msk.bf16.vlgmr.msrb.gmra.mxu3 %vm3644_vm4, %v2589_v7  ;;  %v3358_v55 = vpop.f32.mrf.mxu0 }
 0x14f   :  { %2184 = vmatmul.msk.bf16.gmra.mxu0 %vm2183_vm14, %v2589_v7  ;;  %v1017_v37 = vpop.f32.mrf.mxu1 }
 0x150   :  { %2216 = vmatmul.msk.bf16.gmra.mxu1 %vm2215_vm3, %v2589_v7 }
 0x151   :  { %2248 = vmatmul.msk.bf16.gmra.mxu2 %vm2247_vm5, %v2589_v7  ;;  %v1072_v61 = vpop.f32.mrf.mxu3 }
 0x152   :  { %v1073_v0 = vadd.f32 %v1072_v61, %v3239_v60  ;;  %v1103_v60 = vpop.f32.mrf.mxu2 }
 0x156   :  { %v3362_v62 = vpop.f32.mrf.mxu0 }
 0x157   :  { %v1019_v11 = vpop.f32.mrf.mxu1 }
 0x159   :  { %v1074_v18 = vpop.f32.mrf.mxu3 }
 0x15a   :  { %v1075_v19 = vadd.f32 %v1074_v18, %v3247_v3 }
 0x15e   :  { %2260 = vmatmul.msk.bf16.gmra.mxu3 %vm3645_vm9, %v2589_v7  ;;  %v3371_v8 = vpop.f32.mrf.mxu0 }
 0x15f   :  { %v1022_v61 = vpop.f32.mrf.mxu1 }
 0x161   :  { %v1077_v21 = vpop.f32.mrf.mxu3 }
 0x162   :  { %v1078_v22 = vadd.f32 %v1077_v21, %v988_v4  ;;  %v1106_v4 = vpop.f32.mrf.mxu2 }
 0x167   :  { %v1024_v21 = vpop.f32.mrf.mxu1 }
 0x169   :  { %v1079_v23 = vpop.f32.mrf.mxu3 }
 0x16a   :  { %v1080_v24 = vadd.f32 %v1079_v23, %v990_v9 }
 0x16e   :  { %2262 = vmatmul.msk.bf16.gmra.mxu3 %vm3646_vm1, %v2589_v7 }
 0x171   :  { %v1082_v26 = vpop.f32.mrf.mxu3 }
 0x172   :  { %v1083_v28 = vadd.f32 %v1082_v26, %v993_v10  ;;  %v1013_v26 = vadd.f32 %v1012_v50, %v3332_v25  ;;  %v1020_v50 = vadd.f32 %v1019_v11, %v3344_v29  ;;  %v1023_v29 = vadd.f32 %v1022_v61, %v3351_v34  ;;  %v2427_v61 = vld [vmem:[#allocation5 + $0x10] sm:$0xff] }
 0x174   :  { %v1102_v30 = vadd.f32 %v1101_v52, %v1013_v26 }
 0x179   :  { %v1084_v27 = vpop.f32.mrf.mxu3 }
 0x17a   :  { %v1085_v32 = vadd.f32 %v1084_v27, %v995_v12  ;;  %v1108_v12 = vpop.f32.mrf.mxu2 }
 0x17e   :  { %2264 = vmatmul.msk.bf16.gmra.mxu3 %vm3647_vm2, %v2589_v7 }
 0x181   :  { %v1087_v35 = vpop.f32.mrf.mxu3 }
 0x182   :  { %v1088_v38 = vadd.f32 %v1087_v35, %v998_v5  ;;  %v3375_v5 = vpop.f32.mrf.mxu0 }
 0x189   :  { %v1089_v39 = vpop.f32.mrf.mxu3 }
 0x18a   :  { %v1090_v40 = vadd.f32 %v1089_v39, %v1000_v15  ;;  %v3382_v18 = vpop.f32.mrf.mxu0 }
 0x18e   :  { %2266 = vmatmul.msk.bf16.gmra.mxu3 %vm3648_vm7, %v2589_v7 }
 0x191   :  { %v1161_v45 = vpop.f32.mrf.mxu3 }
 0x192   :  { %v3349_v47 = vadd.f32 %v1161_v45, %v1073_v0  ;;  %v1111_v0 = vpop.f32.mrf.mxu2  ;;  %v3389_v23 = vpop.f32.mrf.mxu0 }
 0x193   :  { %v1112_v11 = vadd.f32 %v1111_v0, %v1023_v29 }
 0x199   :  { %v1163_v48 = vpop.f32.mrf.mxu3 }
 0x19a   :  { %v3353_v49 = vadd.f32 %v1163_v48, %v1075_v19  ;;  %v3393_v46 = vpop.f32.mrf.mxu0 }
 0x19e   :  { %2268 = vmatmul.msk.bf16.gmra.mxu3 %vm3649_vm8, %v2589_v7 }
 0x1a1   :  { %v1166_v36 = vpop.f32.mrf.mxu3 }
 0x1a2   :  { %v3360_v56 = vadd.f32 %v1166_v36, %v1078_v22  ;;  %v1113_v22 = vpop.f32.mrf.mxu2  ;;  %v3398_v48 = vpop.f32.mrf.mxu0  ;;  %v1109_v36 = vadd.f32 %v1108_v12, %v1020_v50  ;;  %v2440_v50 = vld [vmem:[#allocation7 + $0x38] sm:$0xff] }
 0x1a3   :  { %1764 = vmatpush.bf16.msrb.mxu2 %v2440_v50 }
 0x1a9   :  { %v1168_v1 = vpop.f32.mrf.mxu3 }
 0x1aa   :  { %v3364_v2 = vadd.f32 %v1168_v1, %v1080_v24  ;;  %v2429_v24 = vld [vmem:[#allocation5 + $0x20] sm:$0xff]  ;;  %v2428_v1 = vld [vmem:[#allocation5 + $0x18] sm:$0xff] }
 0x1ab   :  { %1562 = vmatpush.bf16.msrb.mxu1 %v2429_v24 }
 0x1ae   :  { %2270 = vmatmul.msk.bf16.gmra.mxu3 %vm3081_vm0, %v2589_v7  ;;  %vm3650_vm0 = vnez %v3603_v13  ;;  %v2426_v13 = vld [vmem:[#allocation5 + $0x8] sm:$0xff] }
 0x1af   :  { %1563 = vmatpush.bf16.msrb.mxu1 %v2428_v1 }
 0x1b1   :  { %v1171_v3 = vpop.f32.mrf.mxu3 }
 0x1b2   :  { %v3369_v6 = vadd.f32 %v1171_v3, %v1083_v28  ;;  %v1015_v28 = vadd.f32 %v1014_v59, %v3337_v31  ;;  %v1018_v31 = vadd.f32 %v1017_v37, %v3342_v33  ;;  %v1025_v37 = vadd.f32 %v1024_v21, %v3358_v55 }
 0x1b3   :  { %1564 = vmatpush.bf16.msrb.mxu1 %v2427_v61 }
 0x1b4   :  { %v1104_v27 = vadd.f32 %v1103_v60, %v1015_v28  ;;  %v1107_v52 = vadd.f32 %v1106_v4, %v1018_v31  ;;  %v1114_v12 = vadd.f32 %v1113_v22, %v1025_v37 }
 0x1b7   :  { %1565 = vmatpush.bf16.msrb.mxu1 %v2426_v13 }
 0x1b9   :  { %v1173_v9 = vpop.f32.mrf.mxu3 }
 0x1ba   :  { %v3373_v10 = vadd.f32 %v1173_v9, %v1085_v32  ;;  %v1027_v32 = vpop.f32.mrf.mxu1  ;;  %v3405_v9 = vpop.f32.mrf.mxu0 }
 0x1bb   :  { %v1028_v0 = vadd.f32 %v1027_v32, %v3362_v62 }
 0x1be   :  { %2272 = vmatmul.msk.bf16.gmra.mxu3 %vm3089_vm11, %v2589_v7  ;;  %vm3651_vm11 = vnez %v3605_v16 }
 0x1c1   :  { %v1176_v42 = vpop.f32.mrf.mxu3 }
 0x1c2   :  { %v3380_v15 = vadd.f32 %v1176_v42, %v1088_v38  ;;  %v1116_v38 = vpop.f32.mrf.mxu2  ;;  %v1029_v45 = vpop.f32.mrf.mxu1 }
 0x1c3   :  { %v3409_v42 = vpop.f32.mrf.mxu0  ;;  %v1030_v21 = vadd.f32 %v1029_v45, %v3371_v8  ;;  %v1117_v22 = vadd.f32 %v1116_v38, %v1028_v0 }
 0x1c9   :  { %v1178_v19 = vpop.f32.mrf.mxu3 }
 0x1ca   :  { %v3384_v63 = vadd.f32 %v1178_v19, %v1090_v40  ;;  %v1118_v25 = vpop.f32.mrf.mxu2  ;;  %v1032_v3 = vpop.f32.mrf.mxu1 }
 0x1cb   :  { %v3414_v55 = vpop.f32.mrf.mxu0  ;;  %v1033_v8 = vadd.f32 %v1032_v3, %v3375_v5 }
 0x1ce   :  { %2274 = vmatmul.msk.bf16.gmra.mxu3 %vm3099_vm15, %v2589_v7  ;;  %vm3652_vm15 = vnez %v3607_v17 }
 0x1d1   :  { %v1190_v44 = vpop.f32.mrf.mxu3 }
 0x1d2   :  { %v1191_v39 = vadd.f32 %v1190_v44, %v1102_v30  ;;  %v1121_v51 = vpop.f32.mrf.mxu2  ;;  %v1034_v4 = vpop.f32.mrf.mxu1  ;;  %v1119_v30 = vadd.f32 %v1118_v25, %v1030_v21 }
 0x1d3   :  { %v1035_v32 = vadd.f32 %v1034_v4, %v3382_v18  ;;  %v1122_v25 = vadd.f32 %v1121_v51, %v1033_v8 }
 0x1d9   :  { %v1192_v35 = vpop.f32.mrf.mxu3 }
 0x1da   :  { %v1193_v40 = vadd.f32 %v1192_v35, %v1104_v27  ;;  %v1123_v14 = vpop.f32.mrf.mxu2  ;;  %v1037_v26 = vpop.f32.mrf.mxu1 }
 0x1db   :  { %v1038_v3 = vadd.f32 %v1037_v26, %v3389_v23 }
 0x1dc   :  { %v1270_v41 = vpack.c.bf16 %v1193_v40, %v1191_v39 }
 0x1de   :  { %2276 = vmatmul.msk.bf16.gmra.mxu3 %vm3137_vm10, %v2589_v7  ;;  %1362 = vmatmul.bf16.vlgmr.msrb.gmra.mxu0 %v1270_v41  ;;  %vm3653_vm10 = vnez %v3613_v20 }
 0x1e1   :  { %v1195_v43 = vpop.f32.mrf.mxu3 }
 0x1e2   :  { %v1196_v58 = vadd.f32 %v1195_v43, %v1107_v52  ;;  %v1126_v34 = vpop.f32.mrf.mxu2  ;;  %v1039_v40 = vpop.f32.mrf.mxu1  ;;  %v1124_v52 = vadd.f32 %v1123_v14, %v1035_v32 }
 0x1e3   :  { %v3418_v43 = vpop.f32.mrf.mxu0  ;;  %v1040_v51 = vadd.f32 %v1039_v40, %v3393_v46 }
 0x1e9   :  { %v1197_v57 = vpop.f32.mrf.mxu3 }
 0x1ea   :  { %v1198_v59 = vadd.f32 %v1197_v57, %v1109_v36  ;;  %v1128_v54 = vpop.f32.mrf.mxu2  ;;  %v1042_v62 = vpop.f32.mrf.mxu1 }
 0x1eb   :  { %v3425_v45 = vpop.f32.mrf.mxu0  ;;  %v1129_v29 = vadd.f32 %v1128_v54, %v1040_v51 }
 0x1ec   :  { %v1271_v60 = vpack.c.bf16 %v1198_v59, %v1196_v58 }
 0x1ee   :  { %2278 = vmatmul.msk.bf16.gmra.mxu3 %vm3143_vm12, %v2589_v7  ;;  %1367 = vmatmul.bf16.gmra.mxu0 %v1271_v60 }
 0x1f1   :  { %v1200_v33 = vpop.f32.mrf.mxu3 }
 0x1f2   :  { %v1201_v44 = vadd.f32 %v1200_v33, %v1112_v11  ;;  %v1131_v38 = vpop.f32.mrf.mxu2  ;;  %v1044_v60 = vpop.f32.mrf.mxu1  ;;  %v1127_v33 = vadd.f32 %v1126_v34, %v1038_v3 }
 0x1f3   :  { %v3430_v1 = vpop.f32.mrf.mxu0  ;;  %v1045_v34 = vadd.f32 %v1044_v60, %v3405_v9 }
 0x1f9   :  { %v1202_v19 = vpop.f32.mrf.mxu3 }
 0x1fa   :  { %v1203_v24 = vadd.f32 %v1202_v19, %v1114_v12  ;;  %v1133_v5 = vpop.f32.mrf.mxu2  ;;  %v1047_v37 = vpop.f32.mrf.mxu1 }
 0x1fb   :  { %v3434_v16 = vpop.f32.mrf.mxu0  ;;  %v1134_v0 = vadd.f32 %v1133_v5, %v1045_v34  ;;  %v1048_v54 = vadd.f32 %v1047_v37, %v3409_v42  ;;  %v2437_v37 = vld [vmem:[#allocation7 + $0x20] sm:$0xff] }
 0x1fc   :  { %v1272_v53 = vpack.c.bf16 %v1203_v24, %v1201_v44  ;;  %v2439_v44 = vld [vmem:[#allocation7 + $0x30] sm:$0xff]  ;;  %v2425_v24 = vld [vmem:[#allocation5] sm:$0xff] }
 0x1fd   :  { %1765 = vmatpush.bf16.msrb.mxu2 %v2439_v44  ;;  %1566 = vmatpush.bf16.msrb.mxu1 %v2425_v24 }
 0x1fe   :  { %2280 = vmatmul.msk.bf16.gmra.mxu3 %vm3151_vm6, %v2589_v7  ;;  %1372 = vmatmul.bf16.gmra.mxu0 %v1272_v53 }
 0x201   :  { %v1205_v28 = vpop.f32.mrf.mxu3 }
 0x202   :  { %v1206_v35 = vadd.f32 %v1205_v28, %v1117_v22  ;;  %v1136_v11 = vpop.f32.mrf.mxu2  ;;  %v1049_v46 = vpop.f32.mrf.mxu1  ;;  %v1043_v28 = vadd.f32 %v1042_v62, %v3398_v48  ;;  %v2438_v62 = vld [vmem:[#allocation7 + $0x28] sm:$0xff] }
 0x203   :  { %v3439_v26 = vpop.f32.mrf.mxu0  ;;  %v1050_v48 = vadd.f32 %v1049_v46, %v3414_v55  ;;  %1766 = vmatpush.bf16.msrb.mxu2 %v2438_v62 }
 0x204   :  { %v1132_v61 = vadd.f32 %v1131_v38, %v1043_v28 }
 0x207   :  { %1767 = vmatpush.bf16.msrb.mxu2 %v2437_v37 }
 0x209   :  { %v1207_v27 = vpop.f32.mrf.mxu3 }
 0x20a   :  { %v1208_v39 = vadd.f32 %v1207_v27, %v1119_v30  ;;  %v1138_v53 = vpop.f32.mrf.mxu2  ;;  %v1052_v27 = vpop.f32.mrf.mxu1 }
 0x20b   :  { %v1053_v42 = vadd.f32 %v1052_v27, %v3418_v43 }
 0x20c   :  { %v1273_v41 = vpack.c.bf16 %v1208_v39, %v1206_v35  ;;  %v975_v39 = vpop.f32.mrf.mxu0 }
 0x20e   :  { %2282 = vmatmul.msk.bf16.gmra.mxu3 %vm3650_vm0, %v2589_v7  ;;  %1377 = vmatmul.bf16.gmra.mxu0 %v1273_v41  ;;  %v1137_v41 = vadd.f32 %v1136_v11, %v1048_v54 }
 0x211   :  { %v1210_v31 = vpop.f32.mrf.mxu3 }
 0x212   :  { %v1211_v57 = vadd.f32 %v1210_v31, %v1122_v25  ;;  %v1141_v35 = vpop.f32.mrf.mxu2  ;;  %v1054_v9 = vpop.f32.mrf.mxu1  ;;  %v1139_v31 = vadd.f32 %v1138_v53, %v1050_v48 }
 0x213   :  { %v1055_v55 = vadd.f32 %v1054_v9, %v3425_v45 }
 0x214   :  { %v3448_v8 = vpop.f32.mrf.mxu0 }
 0x219   :  { %v1212_v36 = vpop.f32.mrf.mxu3 }
 0x21a   :  { %v1213_v58 = vadd.f32 %v1212_v36, %v1124_v52  ;;  %v1143_v50 = vpop.f32.mrf.mxu2 }
 0x21c   :  { %v1274_v59 = vpack.c.bf16 %v1213_v58, %v1211_v57  ;;  %v3450_v57 = vpop.f32.mrf.mxu0  ;;  %v1142_v58 = vadd.f32 %v1141_v35, %v1053_v42 }
 0x21e   :  { %2284 = vmatmul.msk.bf16.gmra.mxu3 %vm3651_vm11, %v2589_v7  ;;  %1382 = vmatmul.bf16.gmra.mxu0 %v1274_v59  ;;  %v1144_v59 = vadd.f32 %v1143_v50, %v1055_v55 }
 0x221   :  { %v1215_v18 = vpop.f32.mrf.mxu3 }
 0x222   :  { %v1216_v12 = vadd.f32 %v1215_v18, %v1127_v33  ;;  %v1146_v36 = vpop.f32.mrf.mxu2 }
 0x229   :  { %v1217_v4 = vpop.f32.mrf.mxu3 }
 0x22a   :  { %v1218_v14 = vadd.f32 %v1217_v4, %v1129_v29  ;;  %v1148_v33 = vpop.f32.mrf.mxu2  ;;  %v3457_v29 = vld [vmem:[%s3584_s3] ss:$0 sm:$0xff] }
 0x22c   :  { %v1275_v19 = vpack.c.bf16 %v1218_v14, %v1216_v12 }
 0x22e   :  { %2286 = vmatmul.msk.bf16.gmra.mxu3 %vm3652_vm15, %v2589_v7  ;;  %1387 = vmatmul.bf16.gmra.mxu0 %v1275_v19 }
 0x231   :  { %v1220_v23 = vpop.f32.mrf.mxu3 }
 0x232   :  { %v1221_v22 = vadd.f32 %v1220_v23, %v1132_v61  ;;  %v1151_v24 = vpop.f32.mrf.mxu2 }
 0x239   :  { %v1222_v21 = vpop.f32.mrf.mxu3 }
 0x23a   :  { %v1223_v17 = vadd.f32 %v1222_v21, %v1134_v0 }
 0x23c   :  { %v1276_v30 = vpack.c.bf16 %v1223_v17, %v1221_v22 }
 0x23e   :  { %2288 = vmatmul.msk.bf16.gmra.mxu3 %vm3653_vm10, %v2589_v7  ;;  %1392 = vmatmul.bf16.gmra.mxu0 %v1276_v30  ;;  %v1057_v7 = vpop.f32.mrf.mxu1  ;;  %v1153_v30 = vpop.f32.mrf.mxu2 }
 0x23f   :  { %v1058_v14 = vadd.f32 %v1057_v7, %v3430_v1 }
 0x241   :  { %v1225_v40 = vpop.f32.mrf.mxu3  ;;  %v1147_v46 = vadd.f32 %v1146_v36, %v1058_v14 }
 0x242   :  { %v1226_v38 = vadd.f32 %v1225_v40, %v1137_v41  ;;  %v2436_v41 = vld [vmem:[#allocation7 + $0x18] sm:$0xff] }
 0x243   :  { %1768 = vmatpush.bf16.msrb.mxu2 %v2436_v41 }
 0x246   :  { %v1059_v18 = vpop.f32.mrf.mxu1  ;;  %v1156_v7 = vpop.f32.mrf.mxu2 }
 0x247   :  { %v1060_v19 = vadd.f32 %v1059_v18, %v3434_v16 }
 0x249   :  { %v1227_v32 = vpop.f32.mrf.mxu3  ;;  %v1149_v53 = vadd.f32 %v1148_v33, %v1060_v19 }
 0x24a   :  { %v1228_v25 = vadd.f32 %v1227_v32, %v1139_v31 }
 0x24c   :  { %v1277_v20 = vpack.c.bf16 %v1228_v25, %v1226_v38 }
 0x24e   :  { %1397 = vmatmul.bf16.gmra.mxu0 %v1277_v20  ;;  %v1062_v12 = vpop.f32.mrf.mxu1 }
 0x24f   :  { %v1063_v40 = vadd.f32 %v1062_v12, %v3439_v26  ;;  %v2435_v12 = vld [vmem:[#allocation7 + $0x10] sm:$0xff] }
 0x250   :  { %1769 = vmatpush.bf16.msrb.mxu2 %v2435_v12 }
 0x251   :  { %v1230_v52 = vpop.f32.mrf.mxu3  ;;  %v1152_v31 = vadd.f32 %v1151_v24, %v1063_v40 }
 0x252   :  { %v1231_v60 = vadd.f32 %v1230_v52, %v1142_v58 }
 0x256   :  { %v1064_v17 = vpop.f32.mrf.mxu1 }
 0x257   :  { %v1065_v54 = vadd.f32 %v1064_v17, %v975_v39 }
 0x259   :  { %v1232_v13 = vpop.f32.mrf.mxu3  ;;  %v1154_v50 = vadd.f32 %v1153_v30, %v1065_v54 }
 0x25a   :  { %v1233_v5 = vadd.f32 %v1232_v13, %v1144_v59  ;;  %v1158_v59 = vpop.f32.mrf.mxu2 }
 0x25b   :  { %v1363_v3 = vpop.f32.mrf.mxu0 }
 0x25c   :  { %v1278_v51 = vpack.c.bf16 %v1233_v5, %v1231_v60  ;;  %v1364_v45 = vadd.f32 %v3457_v29, %v1363_v3 }
 0x25e   :  { %1402 = vmatmul.bf16.gmra.mxu0 %v1278_v51  ;;  %v1443_v44 = vmax.f32 %v1364_v45, 0.0  ;;  %v1067_v32 = vpop.f32.mrf.mxu1 }
 0x25f   :  { %v1068_v13 = vadd.f32 %v1067_v32, %v3448_v8 }
 0x261   :  { %v1235_v43 = vpop.f32.mrf.mxu3  ;;  %v1157_v3 = vadd.f32 %v1156_v7, %v1068_v13  ;;  %v2433_v7 = vld [vmem:[#allocation7] sm:$0xff] }
 0x262   :  { %v1236_v61 = vadd.f32 %v1235_v43, %v1147_v46 }
 0x263   :  { %v1365_v4 = vpop.f32.mrf.mxu0 }
 0x264   :  { %v1366_v11 = vadd.f32 %v3457_v29, %v1365_v4 }
 0x266   :  { %v1444_v23 = vmax.f32 %v1366_v11, 0.0  ;;  %v1069_v39 = vpop.f32.mrf.mxu1 }
 0x267   :  { %v1070_v60 = vadd.f32 %v1069_v39, %v3450_v57 }
 0x268   :  { %v1475_v28 = vpack.c.bf16 %v1444_v23, %v1443_v44 }
 0x269   :  { %v1237_v34 = vpop.f32.mrf.mxu3  ;;  %v1159_v51 = vadd.f32 %v1158_v59, %v1070_v60 }
 0x26a   :  { %v1238_v0 = vadd.f32 %v1237_v34, %v1149_v53  ;;  %1567 = vmatmul.bf16.vlgmr.msrb.gmra.mxu1 %v1475_v28 }
 0x26b   :  { %v1368_v21 = vpop.f32.mrf.mxu0 }
 0x26c   :  { %v1279_v22 = vpack.c.bf16 %v1238_v0, %v1236_v61  ;;  %v1369_v1 = vadd.f32 %v3457_v29, %v1368_v21 }
 0x26e   :  { %1407 = vmatmul.bf16.gmra.mxu0 %v1279_v22  ;;  %v1445_v48 = vmax.f32 %v1369_v1, 0.0 }
 0x271   :  { %v1240_v27 = vpop.f32.mrf.mxu3 }
 0x272   :  { %v1241_v25 = vadd.f32 %v1240_v27, %v1152_v31 }
 0x273   :  { %v1370_v35 = vpop.f32.mrf.mxu0 }
 0x274   :  { %v1371_v16 = vadd.f32 %v3457_v29, %v1370_v35  ;;  %v2434_v35 = vld [vmem:[#allocation7 + $0x8] sm:$0xff] }
 0x275   :  { %1770 = vmatpush.bf16.msrb.mxu2 %v2434_v35 }
 0x276   :  { %v1446_v9 = vmax.f32 %v1371_v16, 0.0 }
 0x278   :  { %v1476_v62 = vpack.c.bf16 %v1446_v9, %v1445_v48 }
 0x279   :  { %v1242_v38 = vpop.f32.mrf.mxu3  ;;  %1771 = vmatpush.bf16.msrb.mxu2 %v2433_v7 }
 0x27a   :  { %v1243_v20 = vadd.f32 %v1242_v38, %v1154_v50  ;;  %1572 = vmatmul.bf16.gmra.mxu1 %v1476_v62 }
 0x27b   :  { %v1373_v52 = vpop.f32.mrf.mxu0 }
 0x27c   :  { %v1280_v36 = vpack.c.bf16 %v1243_v20, %v1241_v25  ;;  %v1374_v26 = vadd.f32 %v3457_v29, %v1373_v52 }
 0x27e   :  { %1412 = vmatmul.bf16.gmra.mxu0 %v1280_v36  ;;  %v1447_v5 = vmax.f32 %v1374_v26, 0.0 }
 0x281   :  { %v1245_v42 = vpop.f32.mrf.mxu3 }
 0x282   :  { %v1246_v43 = vadd.f32 %v1245_v42, %v1157_v3 }
 0x283   :  { %v1375_v55 = vpop.f32.mrf.mxu0 }
 0x284   :  { %v1376_v58 = vadd.f32 %v3457_v29, %v1375_v55 }
 0x286   :  { %v1448_v18 = vmax.f32 %v1376_v58, 0.0 }
 0x288   :  { %v1477_v33 = vpack.c.bf16 %v1448_v18, %v1447_v5 }
 0x289   :  { %v1247_v37 = vpop.f32.mrf.mxu3 }
 0x28a   :  { %v1248_v45 = vadd.f32 %v1247_v37, %v1159_v51  ;;  %1577 = vmatmul.bf16.gmra.mxu1 %v1477_v33 }
 0x28b   :  { %v1378_v4 = vpop.f32.mrf.mxu0 }
 0x28c   :  { %v1281_v11 = vpack.c.bf16 %v1248_v45, %v1246_v43  ;;  %v1379_v19 = vadd.f32 %v3457_v29, %v1378_v4 }
 0x28e   :  { %1417 = vmatmul.bf16.gmra.mxu0 %v1281_v11  ;;  %v1449_v44 = vmax.f32 %v1379_v19, 0.0  ;;  %v3493_v19 = vld [vmem:[%s3586_s5] ss:$0 sm:$0xff] }
 0x291   :  { %v1250_v14 = vpop.f32.mrf.mxu3 }
 0x292   :  { %v1251_v53 = vadd.f32 %v1250_v14, %v3349_v47 }
 0x293   :  { %v1380_v8 = vpop.f32.mrf.mxu0 }
 0x294   :  { %v1381_v57 = vadd.f32 %v3457_v29, %v1380_v8 }
 0x296   :  { %v1450_v23 = vmax.f32 %v1381_v57, 0.0 }
 0x298   :  { %v1478_v24 = vpack.c.bf16 %v1450_v23, %v1449_v44 }
 0x299   :  { %v1252_v46 = vpop.f32.mrf.mxu3 }
 0x29a   :  { %v1253_v28 = vadd.f32 %v1252_v46, %v3353_v49  ;;  %1582 = vmatmul.bf16.gmra.mxu1 %v1478_v24 }
 0x29b   :  { %v1383_v34 = vpop.f32.mrf.mxu0 }
 0x29c   :  { %v1282_v61 = vpack.c.bf16 %v1253_v28, %v1251_v53  ;;  %v1384_v21 = vadd.f32 %v3457_v29, %v1383_v34 }
 0x29e   :  { %1422 = vmatmul.bf16.gmra.mxu0 %v1282_v61  ;;  %v1451_v30 = vmax.f32 %v1384_v21, 0.0 }
 0x2a1   :  { %v1255_v0 = vpop.f32.mrf.mxu3 }
 0x2a2   :  { %v1256_v40 = vadd.f32 %v1255_v0, %v3360_v56 }
 0x2a3   :  { %v1385_v22 = vpop.f32.mrf.mxu0 }
 0x2a4   :  { %v1386_v17 = vadd.f32 %v3457_v29, %v1385_v22 }
 0x2a6   :  { %v1452_v27 = vmax.f32 %v1386_v17, 0.0 }
 0x2a8   :  { %v1479_v1 = vpack.c.bf16 %v1452_v27, %v1451_v30 }
 0x2a9   :  { %v1257_v16 = vpop.f32.mrf.mxu3 }
 0x2aa   :  { %v1258_v47 = vadd.f32 %v1257_v16, %v3364_v2  ;;  %1587 = vmatmul.bf16.gmra.mxu1 %v1479_v1 }
 0x2ab   :  { %v1388_v49 = vpop.f32.mrf.mxu0 }
 0x2ac   :  { %v1283_v54 = vpack.c.bf16 %v1258_v47, %v1256_v40  ;;  %v1389_v9 = vadd.f32 %v3457_v29, %v1388_v49 }
 0x2ae   :  { %1427 = vmatmul.bf16.gmra.mxu0 %v1283_v54  ;;  %v1453_v50 = vmax.f32 %v1389_v9, 0.0 }
 0x2b1   :  { %v1260_v48 = vpop.f32.mrf.mxu3 }
 0x2b2   :  { %v1261_v25 = vadd.f32 %v1260_v48, %v3369_v6 }
 0x2b3   :  { %v1390_v41 = vpop.f32.mrf.mxu0 }
 0x2b4   :  { %v1391_v31 = vadd.f32 %v3457_v29, %v1390_v41 }
 0x2b6   :  { %v1454_v62 = vmax.f32 %v1391_v31, 0.0 }
 0x2b8   :  { %v1480_v32 = vpack.c.bf16 %v1454_v62, %v1453_v50 }
 0x2b9   :  { %v1262_v38 = vpop.f32.mrf.mxu3 }
 0x2ba   :  { %v1263_v56 = vadd.f32 %v1262_v38, %v3373_v10  ;;  %1592 = vmatmul.bf16.gmra.mxu1 %v1480_v32 }
 0x2bb   :  { %v1393_v2 = vpop.f32.mrf.mxu0 }
 0x2bc   :  { %v1284_v20 = vpack.c.bf16 %v1263_v56, %v1261_v25  ;;  %v1394_v36 = vadd.f32 %v3457_v29, %v1393_v2 }
 0x2be   :  { %1432 = vmatmul.bf16.gmra.mxu0 %v1284_v20  ;;  %v1455_v39 = vmax.f32 %v1394_v36, 0.0 }
 0x2c1   :  { %v1265_v52 = vpop.f32.mrf.mxu3 }
 0x2c2   :  { %v1266_v6 = vadd.f32 %v1265_v52, %v3380_v15 }
 0x2c3   :  { %v1395_v42 = vpop.f32.mrf.mxu0 }
 0x2c4   :  { %v1396_v26 = vadd.f32 %v3457_v29, %v1395_v42 }
 0x2c6   :  { %v1456_v55 = vmax.f32 %v1396_v26, 0.0 }
 0x2c8   :  { %v1481_v58 = vpack.c.bf16 %v1456_v55, %v1455_v39 }
 0x2c9   :  { %v1267_v59 = vpop.f32.mrf.mxu3 }
 0x2ca   :  { %v1268_v10 = vadd.f32 %v1267_v59, %v3384_v63  ;;  %1597 = vmatmul.bf16.gmra.mxu1 %v1481_v58 }
 0x2cb   :  { %v1398_v13 = vpop.f32.mrf.mxu0 }
 0x2cc   :  { %v1285_v60 = vpack.c.bf16 %v1268_v10, %v1266_v6  ;;  %v1399_v5 = vadd.f32 %v3457_v29, %v1398_v13 }
 0x2ce   :  { %1437 = vmatmul.bf16.gmra.mxu0 %v1285_v60  ;;  %v1457_v51 = vmax.f32 %v1399_v5, 0.0 }
 0x2d3   :  { %v1400_v18 = vpop.f32.mrf.mxu0 }
 0x2d4   :  { %v1401_v3 = vadd.f32 %v3457_v29, %v1400_v18 }
 0x2d6   :  { %v1458_v33 = vmax.f32 %v1401_v3, 0.0 }
 0x2d8   :  { %v1482_v37 = vpack.c.bf16 %v1458_v33, %v1457_v51 }
 0x2da   :  { %1602 = vmatmul.bf16.gmra.mxu1 %v1482_v37 }
 0x2db   :  { %v1403_v43 = vpop.f32.mrf.mxu0 }
 0x2dc   :  { %v1404_v45 = vadd.f32 %v3457_v29, %v1403_v43 }
 0x2de   :  { %v1459_v63 = vmax.f32 %v1404_v45, 0.0 }
 0x2e3   :  { %v1405_v4 = vpop.f32.mrf.mxu0 }
 0x2e4   :  { %v1406_v15 = vadd.f32 %v3457_v29, %v1405_v4 }
 0x2e6   :  { %v1460_v11 = vmax.f32 %v1406_v15, 0.0 }
 0x2e7   :  { %v1568_v12 = vpop.f32.mrf.mxu1 }
 0x2e8   :  { %v1483_v14 = vpack.c.bf16 %v1460_v11, %v1459_v63  ;;  %v1569_v57 = vadd.f32 %v3493_v19, %v1568_v12 }
 0x2ea   :  { %1607 = vmatmul.bf16.gmra.mxu1 %v1483_v14  ;;  %v1648_v24 = vmax.f32 %v1569_v57, 0.0 }
 0x2eb   :  { %v1408_v8 = vpop.f32.mrf.mxu0 }
 0x2ec   :  { %v1409_v46 = vadd.f32 %v3457_v29, %v1408_v8 }
 0x2ee   :  { %v1461_v0 = vmax.f32 %v1409_v46, 0.0 }
 0x2ef   :  { %v1570_v44 = vpop.f32.mrf.mxu1 }
 0x2f0   :  { %v1571_v23 = vadd.f32 %v3493_v19, %v1570_v44 }
 0x2f2   :  { %v1649_v53 = vmax.f32 %v1571_v23, 0.0 }
 0x2f3   :  { %v1410_v28 = vpop.f32.mrf.mxu0 }
 0x2f4   :  { %v1680_v34 = vpack.c.bf16 %v1649_v53, %v1648_v24  ;;  %v1411_v61 = vadd.f32 %v3457_v29, %v1410_v28 }
 0x2f6   :  { %v1462_v21 = vmax.f32 %v1411_v61, 0.0  ;;  %1772 = vmatmul.bf16.vlgmr.msrb.gmra.mxu2 %v1680_v34 }
 0x2f7   :  { %v1573_v22 = vpop.f32.mrf.mxu1 }
 0x2f8   :  { %v1484_v17 = vpack.c.bf16 %v1462_v21, %v1461_v0  ;;  %v1574_v27 = vadd.f32 %v3493_v19, %v1573_v22 }
 0x2fa   :  { %1612 = vmatmul.bf16.gmra.mxu1 %v1484_v17  ;;  %v1650_v16 = vmax.f32 %v1574_v27, 0.0 }
 0x2fb   :  { %v1413_v30 = vpop.f32.mrf.mxu0 }
 0x2fc   :  { %v1414_v40 = vadd.f32 %v3457_v29, %v1413_v30 }
 0x2fe   :  { %v1463_v9 = vmax.f32 %v1414_v40, 0.0 }
 0x2ff   :  { %v1575_v1 = vpop.f32.mrf.mxu1 }
 0x300   :  { %v1576_v35 = vadd.f32 %v3493_v19, %v1575_v1 }
 0x302   :  { %v1651_v47 = vmax.f32 %v1576_v35, 0.0 }
 0x303   :  { %v1415_v49 = vpop.f32.mrf.mxu0 }
 0x304   :  { %v1416_v54 = vadd.f32 %v3457_v29, %v1415_v49  ;;  %v1681_v48 = vpack.c.bf16 %v1651_v47, %v1650_v16 }
 0x306   :  { %v1464_v41 = vmax.f32 %v1416_v54, 0.0  ;;  %1777 = vmatmul.bf16.gmra.mxu2 %v1681_v48 }
 0x307   :  { %v1578_v31 = vpop.f32.mrf.mxu1 }
 0x308   :  { %v1485_v50 = vpack.c.bf16 %v1464_v41, %v1463_v9  ;;  %v1579_v32 = vadd.f32 %v3493_v19, %v1578_v31 }
 0x30a   :  { %1617 = vmatmul.bf16.gmra.mxu1 %v1485_v50  ;;  %v1652_v56 = vmax.f32 %v1579_v32, 0.0 }
 0x30b   :  { %v1418_v62 = vpop.f32.mrf.mxu0 }
 0x30c   :  { %v1419_v2 = vadd.f32 %v3457_v29, %v1418_v62 }
 0x30e   :  { %v1465_v42 = vmax.f32 %v1419_v2, 0.0 }
 0x30f   :  { %v1580_v38 = vpop.f32.mrf.mxu1 }
 0x310   :  { %v1581_v25 = vadd.f32 %v3493_v19, %v1580_v38 }
 0x312   :  { %v1653_v20 = vmax.f32 %v1581_v25, 0.0 }
 0x313   :  { %v1420_v7 = vpop.f32.mrf.mxu0 }
 0x314   :  { %v1421_v52 = vadd.f32 %v3457_v29, %v1420_v7  ;;  %v1682_v36 = vpack.c.bf16 %v1653_v20, %v1652_v56 }
 0x316   :  { %v1466_v26 = vmax.f32 %v1421_v52, 0.0  ;;  %1782 = vmatmul.bf16.gmra.mxu2 %v1682_v36 }
 0x317   :  { %v1583_v39 = vpop.f32.mrf.mxu1 }
 0x318   :  { %v1486_v55 = vpack.c.bf16 %v1466_v26, %v1465_v42  ;;  %v1584_v59 = vadd.f32 %v3493_v19, %v1583_v39 }
 0x31a   :  { %1622 = vmatmul.bf16.gmra.mxu1 %v1486_v55  ;;  %v1654_v13 = vmax.f32 %v1584_v59, 0.0 }
 0x31b   :  { %v1423_v58 = vpop.f32.mrf.mxu0 }
 0x31c   :  { %v1424_v60 = vadd.f32 %v3457_v29, %v1423_v58 }
 0x31e   :  { %v1467_v33 = vmax.f32 %v1424_v60, 0.0 }
 0x31f   :  { %v1585_v6 = vpop.f32.mrf.mxu1 }
 0x320   :  { %v1586_v10 = vadd.f32 %v3493_v19, %v1585_v6 }
 0x322   :  { %v1655_v5 = vmax.f32 %v1586_v10, 0.0 }
 0x323   :  { %v1425_v18 = vpop.f32.mrf.mxu0 }
 0x324   :  { %v1426_v3 = vadd.f32 %v3457_v29, %v1425_v18  ;;  %v1683_v51 = vpack.c.bf16 %v1655_v5, %v1654_v13  ;;  %v3530_v5 = vld [vmem:[%s3588_s7] ss:$0 sm:$0xff]  ;;  %s2590_s7 = smov [#allocation8]  }
 0x325   :  { %s1889_s23 = sshll.u32 %s2590_s7, 4  ;;  %s1890_s23 = int_to_ptr.vmem [resolvable:$true] %s1889_s23 }
 0x326   :  { %v1468_v37 = vmax.f32 %v1426_v3, 0.0  ;;  %1787 = vmatmul.bf16.gmra.mxu2 %v1683_v51 }
 0x327   :  { %v1588_v43 = vpop.f32.mrf.mxu1 }
 0x328   :  { %v1487_v45 = vpack.c.bf16 %v1468_v37, %v1467_v33  ;;  %v1589_v15 = vadd.f32 %v3493_v19, %v1588_v43 }
 0x32a   :  { %1627 = vmatmul.bf16.gmra.mxu1 %v1487_v45  ;;  %v1656_v12 = vmax.f32 %v1589_v15, 0.0 }
 0x32b   :  { %v1428_v4 = vpop.f32.mrf.mxu0 }
 0x32c   :  { %v1429_v14 = vadd.f32 %v3457_v29, %v1428_v4 }
 0x32e   :  { %v1469_v24 = vmax.f32 %v1429_v14, 0.0 }
 0x32f   :  { %v1590_v63 = vpop.f32.mrf.mxu1 }
 0x330   :  { %v1591_v11 = vadd.f32 %v3493_v19, %v1590_v63 }
 0x332   :  { %v1657_v8 = vmax.f32 %v1591_v11, 0.0 }
 0x333   :  { %v1430_v57 = vpop.f32.mrf.mxu0 }
 0x334   :  { %v1684_v44 = vpack.c.bf16 %v1657_v8, %v1656_v12  ;;  %v1431_v23 = vadd.f32 %v3457_v29, %v1430_v57 }
 0x336   :  { %v1470_v46 = vmax.f32 %v1431_v23, 0.0  ;;  %1792 = vmatmul.bf16.gmra.mxu2 %v1684_v44 }
 0x337   :  { %v1593_v53 = vpop.f32.mrf.mxu1 }
 0x338   :  { %v1488_v28 = vpack.c.bf16 %v1470_v46, %v1469_v24  ;;  %v1594_v61 = vadd.f32 %v3493_v19, %v1593_v53 }
 0x33a   :  { %1632 = vmatmul.bf16.gmra.mxu1 %v1488_v28  ;;  %v1658_v22 = vmax.f32 %v1594_v61, 0.0 }
 0x33b   :  { %v1433_v34 = vpop.f32.mrf.mxu0 }
 0x33c   :  { %v1434_v17 = vadd.f32 %v3457_v29, %v1433_v34 }
 0x33e   :  { %v1471_v16 = vmax.f32 %v1434_v17, 0.0 }
 0x33f   :  { %v1595_v0 = vpop.f32.mrf.mxu1 }
 0x340   :  { %v1596_v21 = vadd.f32 %v3493_v19, %v1595_v0 }
 0x342   :  { %v1659_v30 = vmax.f32 %v1596_v21, 0.0 }
 0x343   :  { %v1435_v27 = vpop.f32.mrf.mxu0 }
 0x344   :  { %v1685_v1 = vpack.c.bf16 %v1659_v30, %v1658_v22  ;;  %v1436_v35 = vadd.f32 %v3457_v29, %v1435_v27 }
 0x346   :  { %v1472_v40 = vmax.f32 %v1436_v35, 0.0  ;;  %1797 = vmatmul.bf16.gmra.mxu2 %v1685_v1 }
 0x347   :  { %v1598_v47 = vpop.f32.mrf.mxu1 }
 0x348   :  { %v1489_v49 = vpack.c.bf16 %v1472_v40, %v1471_v16  ;;  %v1599_v48 = vadd.f32 %v3493_v19, %v1598_v47 }
 0x34a   :  { %1637 = vmatmul.bf16.gmra.mxu1 %v1489_v49  ;;  %v1660_v31 = vmax.f32 %v1599_v48, 0.0 }
 0x34b   :  { %v1438_v54 = vpop.f32.mrf.mxu0 }
 0x34c   :  { %v1439_v50 = vadd.f32 %v3457_v29, %v1438_v54 }
 0x34e   :  { %v1473_v56 = vmax.f32 %v1439_v50, 0.0 }
 0x34f   :  { %v1600_v9 = vpop.f32.mrf.mxu1 }
 0x350   :  { %v1601_v41 = vadd.f32 %v3493_v19, %v1600_v9 }
 0x352   :  { %v1661_v62 = vmax.f32 %v1601_v41, 0.0 }
 0x353   :  { %v1440_v32 = vpop.f32.mrf.mxu0 }
 0x354   :  { %v1686_v38 = vpack.c.bf16 %v1661_v62, %v1660_v31  ;;  %v1441_v25 = vadd.f32 %v3457_v29, %v1440_v32 }
 0x356   :  { %v1474_v2 = vmax.f32 %v1441_v25, 0.0  ;;  %1802 = vmatmul.bf16.gmra.mxu2 %v1686_v38 }
 0x357   :  { %v1603_v20 = vpop.f32.mrf.mxu1 }
 0x358   :  { %v1490_v7 = vpack.c.bf16 %v1474_v2, %v1473_v56  ;;  %v1604_v52 = vadd.f32 %v3493_v19, %v1603_v20 }
 0x35a   :  { %1642 = vmatmul.bf16.gmra.mxu1 %v1490_v7  ;;  %v1662_v26 = vmax.f32 %v1604_v52, 0.0 }
 0x35f   :  { %v1605_v36 = vpop.f32.mrf.mxu1 }
 0x360   :  { %v1606_v42 = vadd.f32 %v3493_v19, %v1605_v36 }
 0x362   :  { %v1663_v39 = vmax.f32 %v1606_v42, 0.0 }
 0x364   :  { %v1687_v55 = vpack.c.bf16 %v1663_v39, %v1662_v26 }
 0x366   :  { %1807 = vmatmul.bf16.gmra.mxu2 %v1687_v55 }
 0x367   :  { %v1608_v58 = vpop.f32.mrf.mxu1 }
 0x368   :  { %v1609_v59 = vadd.f32 %v3493_v19, %v1608_v58 }
 0x36a   :  { %v1664_v10 = vmax.f32 %v1609_v59, 0.0 }
 0x36f   :  { %v1610_v6 = vpop.f32.mrf.mxu1 }
 0x370   :  { %v1611_v29 = vadd.f32 %v3493_v19, %v1610_v6 }
 0x372   :  { %v1665_v13 = vmax.f32 %v1611_v29, 0.0 }
 0x374   :  { %v1688_v60 = vpack.c.bf16 %v1665_v13, %v1664_v10 }
 0x376   :  { %1812 = vmatmul.bf16.gmra.mxu2 %v1688_v60 }
 0x377   :  { %v1613_v18 = vpop.f32.mrf.mxu1 }
 0x378   :  { %v1614_v33 = vadd.f32 %v3493_v19, %v1613_v18 }
 0x379   :  { %v1773_v3 = vpop.f32.mrf.mxu2 }
 0x37a   :  { %v1774_v51 = vadd.f32 %v3530_v5, %v1773_v3  ;;  %v1666_v4 = vmax.f32 %v1614_v33, 0.0 }
 0x37c   :  { %1853 = vst [vmem:[#allocation8] sm:$0xff] %v1774_v51 }
 0x37f   :  { %v1615_v37 = vpop.f32.mrf.mxu1 }
 0x380   :  { %v1616_v43 = vadd.f32 %v3493_v19, %v1615_v37 }
 0x381   :  { %v1775_v45 = vpop.f32.mrf.mxu2 }
 0x382   :  { %v1667_v15 = vmax.f32 %v1616_v43, 0.0  ;;  %v1776_v63 = vadd.f32 %v3530_v5, %v1775_v45 }
 0x384   :  { %v1689_v11 = vpack.c.bf16 %v1667_v15, %v1666_v4  ;;  %1854 = vst [vmem:[#allocation8 + $0x8] sm:$0xff] %v1776_v63 }
 0x386   :  { %1817 = vmatmul.bf16.gmra.mxu2 %v1689_v11 }
 0x387   :  { %v1618_v12 = vpop.f32.mrf.mxu1 }
 0x388   :  { %v1619_v57 = vadd.f32 %v3493_v19, %v1618_v12 }
 0x389   :  { %v1778_v14 = vpop.f32.mrf.mxu2 }
 0x38a   :  { %v1779_v8 = vadd.f32 %v3530_v5, %v1778_v14  ;;  %v1668_v46 = vmax.f32 %v1619_v57, 0.0 }
 0x38c   :  { %1855 = vst [vmem:[#allocation8 + $0x10] sm:$0xff] %v1779_v8 }
 0x38f   :  { %v1620_v44 = vpop.f32.mrf.mxu1 }
 0x390   :  { %v1621_v23 = vadd.f32 %v3493_v19, %v1620_v44 }
 0x391   :  { %v1780_v24 = vpop.f32.mrf.mxu2 }
 0x392   :  { %v1669_v53 = vmax.f32 %v1621_v23, 0.0  ;;  %v1781_v28 = vadd.f32 %v3530_v5, %v1780_v24 }
 0x394   :  { %v1690_v34 = vpack.c.bf16 %v1669_v53, %v1668_v46  ;;  %1856 = vst [vmem:[#allocation8 + $0x18] sm:$0xff] %v1781_v28 }
 0x396   :  { %1822 = vmatmul.bf16.gmra.mxu2 %v1690_v34 }
 0x397   :  { %v1623_v61 = vpop.f32.mrf.mxu1 }
 0x398   :  { %v1624_v22 = vadd.f32 %v3493_v19, %v1623_v61 }
 0x399   :  { %v1783_v0 = vpop.f32.mrf.mxu2 }
 0x39a   :  { %v1784_v21 = vadd.f32 %v3530_v5, %v1783_v0  ;;  %v1670_v1 = vmax.f32 %v1624_v22, 0.0 }
 0x39c   :  { %1857 = vst [vmem:[#allocation8 + $0x20] sm:$0xff] %v1784_v21 }
 0x39f   :  { %v1625_v17 = vpop.f32.mrf.mxu1 }
 0x3a0   :  { %v1626_v30 = vadd.f32 %v3493_v19, %v1625_v17 }
 0x3a1   :  { %v1785_v27 = vpop.f32.mrf.mxu2 }
 0x3a2   :  { %v1671_v35 = vmax.f32 %v1626_v30, 0.0  ;;  %v1786_v16 = vadd.f32 %v3530_v5, %v1785_v27 }
 0x3a4   :  { %v1691_v40 = vpack.c.bf16 %v1671_v35, %v1670_v1  ;;  %1858 = vst [vmem:[#allocation8 + $0x28] sm:$0xff] %v1786_v16 }
 0x3a6   :  { %1827 = vmatmul.bf16.gmra.mxu2 %v1691_v40 }
 0x3a7   :  { %v1628_v47 = vpop.f32.mrf.mxu1 }
 0x3a8   :  { %v1629_v48 = vadd.f32 %v3493_v19, %v1628_v47 }
 0x3a9   :  { %v1788_v49 = vpop.f32.mrf.mxu2 }
 0x3aa   :  { %v1789_v54 = vadd.f32 %v3530_v5, %v1788_v49  ;;  %v1672_v50 = vmax.f32 %v1629_v48, 0.0 }
 0x3ac   :  { %1859 = vst [vmem:[#allocation8 + $0x30] sm:$0xff] %v1789_v54 }
 0x3af   :  { %v1630_v9 = vpop.f32.mrf.mxu1 }
 0x3b0   :  { %v1631_v41 = vadd.f32 %v3493_v19, %v1630_v9 }
 0x3b1   :  { %v1790_v31 = vpop.f32.mrf.mxu2 }
 0x3b2   :  { %v1673_v62 = vmax.f32 %v1631_v41, 0.0  ;;  %v1791_v32 = vadd.f32 %v3530_v5, %v1790_v31 }
 0x3b4   :  { %v1692_v38 = vpack.c.bf16 %v1673_v62, %v1672_v50  ;;  %1860 = vst [vmem:[#allocation8 + $0x38] sm:$0xff] %v1791_v32 }
 0x3b6   :  { %1832 = vmatmul.bf16.gmra.mxu2 %v1692_v38 }
 0x3b7   :  { %v1633_v25 = vpop.f32.mrf.mxu1 }
 0x3b8   :  { %v1634_v20 = vadd.f32 %v3493_v19, %v1633_v25 }
 0x3b9   :  { %v1793_v56 = vpop.f32.mrf.mxu2 }
 0x3ba   :  { %v1794_v2 = vadd.f32 %v3530_v5, %v1793_v56  ;;  %v1674_v42 = vmax.f32 %v1634_v20, 0.0 }
 0x3bc   :  { %1861 = vst [vmem:[#allocation8 + $0x40] sm:$0xff] %v1794_v2 }
 0x3bf   :  { %v1635_v7 = vpop.f32.mrf.mxu1 }
 0x3c0   :  { %v1636_v52 = vadd.f32 %v3493_v19, %v1635_v7 }
 0x3c1   :  { %v1795_v36 = vpop.f32.mrf.mxu2 }
 0x3c2   :  { %v1675_v26 = vmax.f32 %v1636_v52, 0.0  ;;  %v1796_v39 = vadd.f32 %v3530_v5, %v1795_v36 }
 0x3c4   :  { %v1693_v55 = vpack.c.bf16 %v1675_v26, %v1674_v42  ;;  %1862 = vst [vmem:[#allocation8 + $0x48] sm:$0xff] %v1796_v39 }
 0x3c6   :  { %1837 = vmatmul.bf16.gmra.mxu2 %v1693_v55 }
 0x3c7   :  { %v1638_v58 = vpop.f32.mrf.mxu1 }
 0x3c8   :  { %v1639_v29 = vadd.f32 %v3493_v19, %v1638_v58 }
 0x3c9   :  { %v1798_v59 = vpop.f32.mrf.mxu2 }
 0x3ca   :  { %v1799_v6 = vadd.f32 %v3530_v5, %v1798_v59  ;;  %v1676_v18 = vmax.f32 %v1639_v29, 0.0 }
 0x3cc   :  { %1863 = vst [vmem:[#allocation8 + $0x50] sm:$0xff] %v1799_v6 }
 0x3cf   :  { %v1640_v10 = vpop.f32.mrf.mxu1 }
 0x3d0   :  { %v1641_v13 = vadd.f32 %v3493_v19, %v1640_v10 }
 0x3d1   :  { %v1800_v60 = vpop.f32.mrf.mxu2 }
 0x3d2   :  { %v1677_v3 = vmax.f32 %v1641_v13, 0.0  ;;  %v1801_v51 = vadd.f32 %v3530_v5, %v1800_v60 }
 0x3d4   :  { %v1694_v33 = vpack.c.bf16 %v1677_v3, %v1676_v18  ;;  %1864 = vst [vmem:[#allocation8 + $0x58] sm:$0xff] %v1801_v51 }
 0x3d6   :  { %1842 = vmatmul.bf16.gmra.mxu2 %v1694_v33 }
 0x3d7   :  { %v1643_v37 = vpop.f32.mrf.mxu1 }
 0x3d8   :  { %v1644_v4 = vadd.f32 %v3493_v19, %v1643_v37 }
 0x3d9   :  { %v1803_v43 = vpop.f32.mrf.mxu2 }
 0x3da   :  { %v1804_v45 = vadd.f32 %v3530_v5, %v1803_v43  ;;  %v1678_v12 = vmax.f32 %v1644_v4, 0.0 }
 0x3dc   :  { %1865 = vst [vmem:[#allocation8 + $0x60] sm:$0xff] %v1804_v45 }
 0x3df   :  { %v1645_v15 = vpop.f32.mrf.mxu1 }
 0x3e0   :  { %v1646_v63 = vadd.f32 %v3493_v19, %v1645_v15 }
 0x3e1   :  { %v1805_v11 = vpop.f32.mrf.mxu2 }
 0x3e2   :  { %v1679_v14 = vmax.f32 %v1646_v63, 0.0  ;;  %v1806_v8 = vadd.f32 %v3530_v5, %v1805_v11 }
 0x3e4   :  { %v1695_v57 = vpack.c.bf16 %v1679_v14, %v1678_v12  ;;  %1866 = vst [vmem:[#allocation8 + $0x68] sm:$0xff] %v1806_v8 }
 0x3e6   :  { %1847 = vmatmul.bf16.gmra.mxu2 %v1695_v57 }
 0x3e9   :  { %v1808_v44 = vpop.f32.mrf.mxu2 }
 0x3ea   :  { %v1809_v23 = vadd.f32 %v3530_v5, %v1808_v44 }
 0x3ec   :  { %1867 = vst [vmem:[#allocation8 + $0x70] sm:$0xff] %v1809_v23 }
 0x3f1   :  { %v1810_v24 = vpop.f32.mrf.mxu2 }
 0x3f2   :  { %v1811_v46 = vadd.f32 %v3530_v5, %v1810_v24 }
 0x3f4   :  { %1868 = vst [vmem:[#allocation8 + $0x78] sm:$0xff] %v1811_v46 }
 0x3f9   :  { %v1813_v53 = vpop.f32.mrf.mxu2 }
 0x3fa   :  { %v1814_v28 = vadd.f32 %v3530_v5, %v1813_v53 }
 0x3fc   :  { %1869 = vst [vmem:[#allocation8 + $0x80] sm:$0xff] %v1814_v28 }
 0x401   :  { %v1815_v19 = vpop.f32.mrf.mxu2 }
 0x402   :  { %v1816_v34 = vadd.f32 %v3530_v5, %v1815_v19 }
 0x404   :  { %1870 = vst [vmem:[#allocation8 + $0x88] sm:$0xff] %v1816_v34 }
 0x409   :  { %v1818_v61 = vpop.f32.mrf.mxu2 }
 0x40a   :  { %v1819_v0 = vadd.f32 %v3530_v5, %v1818_v61 }
 0x40c   :  { %1871 = vst [vmem:[#allocation8 + $0x90] sm:$0xff] %v1819_v0 }
 0x411   :  { %v1820_v21 = vpop.f32.mrf.mxu2 }
 0x412   :  { %v1821_v22 = vadd.f32 %v3530_v5, %v1820_v21 }
 0x414   :  { %1872 = vst [vmem:[#allocation8 + $0x98] sm:$0xff] %v1821_v22 }
 0x419   :  { %v1823_v17 = vpop.f32.mrf.mxu2 }
 0x41a   :  { %v1824_v30 = vadd.f32 %v3530_v5, %v1823_v17 }
 0x41c   :  { %1873 = vst [vmem:[#allocation8 + $0xa0] sm:$0xff] %v1824_v30 }
 0x421   :  { %v1825_v27 = vpop.f32.mrf.mxu2 }
 0x422   :  { %v1826_v1 = vadd.f32 %v3530_v5, %v1825_v27 }
 0x424   :  { %1874 = vst [vmem:[#allocation8 + $0xa8] sm:$0xff] %v1826_v1 }
 0x429   :  { %v1828_v35 = vpop.f32.mrf.mxu2 }
 0x42a   :  { %v1829_v16 = vadd.f32 %v3530_v5, %v1828_v35 }
 0x42c   :  { %1875 = vst [vmem:[#allocation8 + $0xb0] sm:$0xff] %v1829_v16 }
 0x431   :  { %v1830_v40 = vpop.f32.mrf.mxu2 }
 0x432   :  { %v1831_v47 = vadd.f32 %v3530_v5, %v1830_v40 }
 0x434   :  { %1876 = vst [vmem:[#allocation8 + $0xb8] sm:$0xff] %v1831_v47 }
 0x439   :  { %v1833_v49 = vpop.f32.mrf.mxu2 }
 0x43a   :  { %v1834_v54 = vadd.f32 %v3530_v5, %v1833_v49 }
 0x43c   :  { %1877 = vst [vmem:[#allocation8 + $0xc0] sm:$0xff] %v1834_v54 }
 0x441   :  { %v1835_v48 = vpop.f32.mrf.mxu2 }
 0x442   :  { %v1836_v9 = vadd.f32 %v3530_v5, %v1835_v48 }
 0x444   :  { %1878 = vst [vmem:[#allocation8 + $0xc8] sm:$0xff] %v1836_v9 }
 0x449   :  { %v1838_v41 = vpop.f32.mrf.mxu2 }
 0x44a   :  { %v1839_v31 = vadd.f32 %v3530_v5, %v1838_v41 }
 0x44c   :  { %1879 = vst [vmem:[#allocation8 + $0xd0] sm:$0xff] %v1839_v31 }
 0x451   :  { %v1840_v50 = vpop.f32.mrf.mxu2 }
 0x452   :  { %v1841_v62 = vadd.f32 %v3530_v5, %v1840_v50 }
 0x454   :  { %1880 = vst [vmem:[#allocation8 + $0xd8] sm:$0xff] %v1841_v62 }
 0x459   :  { %v1843_v32 = vpop.f32.mrf.mxu2 }
 0x45a   :  { %v1844_v38 = vadd.f32 %v3530_v5, %v1843_v32 }
 0x45c   :  { %1881 = vst [vmem:[#allocation8 + $0xe0] sm:$0xff] %v1844_v38 }
 0x461   :  { %v1845_v25 = vpop.f32.mrf.mxu2 }
 0x462   :  { %v1846_v56 = vadd.f32 %v3530_v5, %v1845_v25 }
 0x464   :  { %1882 = vst [vmem:[#allocation8 + $0xe8] sm:$0xff] %v1846_v56 }
 0x469   :  { %v1848_v2 = vpop.f32.mrf.mxu2 }
 0x46a   :  { %v1849_v20 = vadd.f32 %v3530_v5, %v1848_v2 }
 0x46c   :  { %1883 = vst [vmem:[#allocation8 + $0xf0] sm:$0xff] %v1849_v20 }
 0x471   :  { %v1850_v7 = vpop.f32.mrf.mxu2 }
 0x472   :  { %v1851_v52 = vadd.f32 %v3530_v5, %v1850_v7 }
 0x474   :  { %1884 = vst [vmem:[#allocation8 + $0xf8] sm:$0xff] %v1851_v52 }
 0x475   :  { %1897 = dma.vmem_to_hbm [thread:$0]  %s1890_s23, 4096, %s1892_s26, [#allocation4], %s2591_s27, %s2591_s27, %s2592_s0  }
 0x476   :  { %2581 = dma.done.wait [#allocation4], 4096  }
 0x477   :  { %2582 = vsyncadd [#allocation4], 4294963200 }
 0x478   :  { %1902 = vsyncpa [#allocation3], 1 }
 0x479   :  { %1903 = vsyncpa [#allocation6], 1 }
 0x47a   :  { %1904 = vsyncpa [#allocation4], 1 }

</bundles_post_ra>
